<compile_context>
chip_gen: v6e
topology: v6e:2x2x1
jax: 0.10.0
libtpu: 0.0.40
codegen_flags: <defaults>
</compile_context>

<pallas_src>
import math
import functools
import numpy as np
import jax
import jax.numpy as jnp
from jax.experimental import pallas as pl
from jax.experimental.pallas import tpu as pltpu


# ----------------------------- fused encoder kernel -------------------------

def _encoder_kernel(x_ref, pos_ref, emb_w_ref, emb_b_ref,
                    qkv_w_ref, qkv_b_ref, out_w_ref, out_b_ref,
                    fc1_w_ref, fc1_b_ref, fc2_w_ref, fc2_b_ref,
                    ln1_g_ref, ln1_b_ref, ffln_g_ref, ffln_b_ref,
                    ln2_g_ref, ln2_b_ref, qscale_ref, hmask_ref,
                    o_ref, h_ref, *, use_tanh_gelu, approx_recip):
    """One grid step = (one batch block, one encoder layer)."""
    f32 = jnp.float32
    b_block, T, Fdim = x_ref.shape          # static
    D = pos_ref.shape[1]                    # static
    H = qscale_ref.shape[1]                 # static
    R = b_block * T                         # rows folded into the MXU M dim
    li = pl.program_id(1)

    def recip(v):
        # EUP reciprocal is opt-in (changes numerics slightly)
        if approx_recip:
            return pl.reciprocal(v, approx=True)
        return 1.0 / v

    # Ones vectors: lane reductions become MXU matmuls (XLU off-load).
    ones_d = jnp.ones((D, 1), f32)
    ones_t = jnp.ones((T, 1), f32)

    def layernorm(z, gamma, beta):
        # nn.LayerNorm: eps=1e-5, biased variance over the last dim.
        mean = jnp.dot(z, ones_d, preferred_element_type=f32) * (1.0 / D)
        zc = z - mean
        var = jnp.dot(zc * zc, ones_d, preferred_element_type=f32) * (1.0 / D)
        return zc * jax.lax.rsqrt(var + 1e-5) * gamma + beta

    def erf_poly(u):
        # Abramowitz & Stegun 7.1.26 (max abs err ~1.5e-7) -> f32-exact GELU.
        a1, a2, a3, a4, a5 = (0.254829592, -0.284496736, 1.421413741,
                              -1.453152027, 1.061405429)
        p = 0.3275911
        sgn = jnp.where(u < 0.0, -1.0, 1.0)
        au = jnp.abs(u)
        t = recip(1.0 + p * au)
        poly = ((((a5 * t + a4) * t + a3) * t + a2) * t + a1) * t
        return sgn * (1.0 - poly * jnp.exp(-au * au))

    def gelu(z):
        if use_tanh_gelu:
            c = math.sqrt(2.0 / math.pi)
            return 0.5 * z * (1.0 + jnp.tanh(c * (z + 0.044715 * z * z * z)))
        # matches nn.GELU() (erf-based, approximate='none')
        return 0.5 * z * (1.0 + erf_poly(z * (1.0 / math.sqrt(2.0))))

    # ---------------- embedding (+ positional encoding) at first layer ------
    @pl.when(li == 0)
    def _():
        xb = x_ref[...].reshape(R, Fdim)
        h_ref[...] = (jnp.dot(xb, emb_w_ref[...], preferred_element_type=f32)
                      + emb_b_ref[...] + pos_ref[...])          # (R, D)

    h = h_ref[...]                                               # (R, D)

    # ---------------- multi-head attention (variable head widths) -----------
    q = jnp.dot(h, qkv_w_ref[0, 0], preferred_element_type=f32) + qkv_b_ref[0, 0]
    k = jnp.dot(h, qkv_w_ref[0, 1], preferred_element_type=f32) + qkv_b_ref[0, 1]
    v = jnp.dot(h, qkv_w_ref[0, 2], preferred_element_type=f32) + qkv_b_ref[0, 2]

    qsc = qscale_ref[0]                                          # (H, 1, D)
    hmk = hmask_ref[0]                                           # (H, 1, D)

    per_b = []
    for b in range(b_block):                                     # small static loop
        qb = q[b * T:(b + 1) * T, :]
        kb = k[b * T:(b + 1) * T, :]
        vb = v[b * T:(b + 1) * T, :]
        # Stack heads along sublanes: row block hh = q masked to head hh's
        # columns, pre-scaled by 1/sqrt(d_h).  One MXU matmul gives every
        # head's score matrix (contraction over D; zeros kill cross-head terms).
        if H > 1:
            q_stk = jnp.concatenate([qb * qsc[hh] for hh in range(H)], axis=0)
        else:
            q_stk = qb * qsc[0]
        s = jax.lax.dot_general(q_stk, kb, (((1,), (1,)), ((), ())),
                                preferred_element_type=f32)      # (H*T, T)
        s = s - jnp.max(s, axis=-1, keepdims=True)
        p = jnp.exp(s)
        denom = jnp.dot(p, ones_t, preferred_element_type=f32)   # MXU row-sum
        attn = p * recip(denom)
        ctx = jnp.dot(attn, vb, preferred_element_type=f32)      # (H*T, D)
        # Recombine heads in registers with lane masks (single dense result).
        ao = ctx[0:T, :] * hmk[0]
        for hh in range(1, H):
            ao = ao + ctx[hh * T:(hh + 1) * T, :] * hmk[hh]
        per_b.append(ao)
    attn_out = per_b[0] if b_block == 1 else jnp.concatenate(per_b, axis=0)

    attn_out = (jnp.dot(attn_out, out_w_ref[0], preferred_element_type=f32)
                + out_b_ref[0])

    # residual + LayerNorm1
    h1 = layernorm(h + attn_out, ln1_g_ref[0], ln1_b_ref[0])

    # ---------------- feed forward (its own LayerNorm, per reference) -------
    ff = jnp.dot(h1, fc1_w_ref[0], preferred_element_type=f32) + fc1_b_ref[0]
    ff = gelu(ff)                                 # (R, d_ff) stays on-chip
    ff = jnp.dot(ff, fc2_w_ref[0], preferred_element_type=f32) + fc2_b_ref[0]
    ff = layernorm(ff + h1, ffln_g_ref[0], ffln_b_ref[0])

    # residual + LayerNorm2 (double LN matches the reference)
    h2 = layernorm(h1 + ff, ln2_g_ref[0], ln2_b_ref[0])
    h_ref[...] = h2                               # carried to the next layer step

    @pl.when(li == pl.num_programs(1) - 1)
    def _():
        o_ref[...] = h2.reshape(b_block, T, D).astype(o_ref.dtype)


# ----------------------------- pallas_call wrapper ---------------------------

def _vmem_limit_bytes(b_block, T, Fdim, D, dff, H):
    """1 layer of weights x 2 pipeline buffers + activations, clamped to 64MiB
    so the same kernel stays portable to v7x's smaller physical VMEM."""
    f = 4  # float32
    R = b_block * T
    per_layer = f * (3 * D * D + 3 * D + D * D + D + D * dff + dff
                     + dff * D + D + 6 * D + 2 * H * D)
    consts = f * (Fdim * D + D + R * D)                 # emb_w, emb_b, pos
    io = f * (R * Fdim + R * D)                         # x block + out block
    scratch = f * R * D
    work = f * (4 * R * dff + 16 * R * D + 4 * H * T * T * b_block)
    total = 2 * (per_layer + consts + io) + scratch + work + (2 << 20)
    return int(min(max(total, 16 << 20), 64 << 20))


def _choose_b_block(B, T, target_rows=256):
    """Fold batch rows into the matmul M dim (target ~128-256 rows per step),
    but keep >= 2 parallel grid steps when B allows so v7x's 2 TCs stay busy."""
    best = 1
    for cand in range(1, B + 1):
        if B % cand == 0 and cand * T <= target_rows:
            best = cand
    if B >= 2 and B // best < 2:
        for cand in range(best - 1, 0, -1):
            if B % cand == 0 and B // cand >= 2:
                best = cand
                break
    return best


@functools.partial(jax.jit,
                   static_argnames=("b_block", "use_tanh_gelu", "approx_recip"))
def encoder_forward_device(x, pos_tiled, emb_w, emb_b, layer_stacks, *,
                           b_block, use_tanh_gelu=False, approx_recip=False):
    """x: (B,T,F); pos_tiled: (b_block*T, D); layer_stacks: per-layer stacked
    arrays with leading L axis."""
    B, T, Fdim = x.shape
    D = pos_tiled.shape[1]
    L = layer_stacks[0].shape[0]
    dff = layer_stacks[4].shape[2]
    H = layer_stacks[14].shape[1]
    NB = B // b_block
    R = b_block * T

    def const_spec(a):
        nd = a.ndim
        return pl.BlockSpec(tuple(a.shape), lambda bi, li, _n=nd: (0,) * _n)

    def layer_spec(a):
        nd = a.ndim
        return pl.BlockSpec((1,) + tuple(a.shape[1:]),
                            lambda bi, li, _n=nd: (li,) + (0,) * (_n - 1))

    in_specs = ([pl.BlockSpec((b_block, T, Fdim), lambda bi, li: (bi, 0, 0)),
                 const_spec(pos_tiled), const_spec(emb_w), const_spec(emb_b)]
                + [layer_spec(a) for a in layer_stacks])

    kernel = functools.partial(_encoder_kernel,
                               use_tanh_gelu=use_tanh_gelu,
                               approx_recip=approx_recip)

    return pl.pallas_call(
        kernel,
        out_shape=jax.ShapeDtypeStruct((B, T, D), jnp.float32),
        grid=(NB, L),
        in_specs=in_specs,
        out_specs=pl.BlockSpec((b_block, T, D), lambda bi, li: (bi, 0, 0)),
        scratch_shapes=[pltpu.VMEM((R, D), jnp.float32)],
        compiler_params=pltpu.CompilerParams(
            dimension_semantics=("parallel", "arbitrary"),
            vmem_limit_bytes=_vmem_limit_bytes(b_block, T, Fdim, D, dff, H)),
    )(x, pos_tiled, emb_w, emb_b, *layer_stacks)


# ------------------------ parameters & preparation ---------------------------

def make_positional_encoding(max_len, d_model):
    pos_enc = np.zeros((max_len, d_model), dtype=np.float32)
    position = np.arange(max_len, dtype=np.float32)[:, None]
    div_term = np.exp(np.arange(0, d_model, 2, dtype=np.float32)
                      * (-math.log(10000.0) / d_model))
    pos_enc[:, 0::2] = np.sin(position * div_term)
    pos_enc[:, 1::2] = np.cos(position * div_term)
    return jnp.asarray(pos_enc)


def _init_linear(key, fan_in, fan_out):
    k1, k2 = jax.random.split(key)
    bound = 1.0 / math.sqrt(fan_in)
    w = jax.random.uniform(k1, (fan_in, fan_out), jnp.float32, -bound, bound)
    b = jax.random.uniform(k2, (fan_out,), jnp.float32, -bound, bound)
    return w, b


def init_encoder_params(key, features_num, d_model, num_layers, num_heads,
                        d_ff, max_len):
    keys = jax.random.split(key, num_layers + 1)
    emb_w, emb_b = _init_linear(keys[0], features_num, d_model)
    layers = []
    for li in range(num_layers):
        lk = jax.random.split(keys[li + 1], 5)
        qkv_w, qkv_b = _init_linear(lk[0], d_model, 3 * d_model)
        out_w, out_b = _init_linear(lk[1], d_model, d_model)
        fc1_w, fc1_b = _init_linear(lk[2], d_model, d_ff)
        fc2_w, fc2_b = _init_linear(lk[3], d_ff, d_model)
        head_logits = jax.random.normal(lk[4], (num_heads,), jnp.float32)
        layers.append(dict(
            qkv_w=qkv_w, qkv_b=qkv_b, out_w=out_w, out_b=out_b,
            fc1_w=fc1_w, fc1_b=fc1_b, fc2_w=fc2_w, fc2_b=fc2_b,
            head_logits=head_logits,
            ln1_g=jnp.ones((d_model,), jnp.float32),
            ln1_b=jnp.zeros((d_model,), jnp.float32),
            ln2_g=jnp.ones((d_model,), jnp.float32),
            ln2_b=jnp.zeros((d_model,), jnp.float32),
            ffln_g=jnp.ones((d_model,), jnp.float32),
            ffln_b=jnp.zeros((d_model,), jnp.float32),
        ))
    return dict(emb_w=emb_w, emb_b=emb_b,
                pos_enc=make_positional_encoding(max_len, d_model),
                layers=layers)


def compute_head_dims_int(logits, d_model, num_heads, min_dim):
    """numpy replica of MultiHeadAttention._compute_integer_dims (static)."""
    logits = np.asarray(logits, dtype=np.float64)
    e = np.exp(logits - logits.max())
    ratios = e / e.sum()
    hdf = min_dim + ratios * (d_model - min_dim * num_heads)
    hdi = np.floor(hdf).astype(np.int64)
    diff = int(d_model - hdi.sum())
    residuals = hdf - np.floor(hdf)
    if diff > 0:
        idx = np.argsort(-residuals)[:abs(diff)]
        hdi[idx] += 1
    elif diff < 0:
        idx = np.argsort(residuals)[:abs(diff)]
        hdi[idx] -= 1
    return tuple(int(d) for d in hdi)


def compute_aux_loss(head_logits, head_dims_int, d_model, num_heads, min_dim):
    """Aux loss depends only on parameters -> computed on host (hoisted).
    Note: not valid under an outer jax.jit (host numpy), and non-differentiable."""
    logits = np.asarray(head_logits, dtype=np.float64)
    e = np.exp(logits - logits.max())
    ratios = e / e.sum()
    hdf = min_dim + ratios * (d_model - min_dim * num_heads)
    hdi = np.asarray(head_dims_int, dtype=np.float64)
    float_loss = (hdf.sum() - d_model) ** 2 + np.maximum(min_dim - hdf, 0.0).mean()
    int_loss = np.mean((hdf - hdi) ** 2)
    return float(float_loss + 0.5 * int_loss)


def prepare_encoder_arrays(params, head_dims_per_layer, d_model, num_heads):
    """One-time repack: split qkv weights, stack per-layer params along L,
    and build static per-head lane masks / 1/sqrt(d_h) scales."""
    D = d_model
    H = num_heads
    layers = params["layers"]
    L = len(layers)

    qkv_w = jnp.stack([jnp.transpose(lp["qkv_w"].reshape(D, 3, D), (1, 0, 2))
                       for lp in layers])                              # (L,3,D,D)
    qkv_b = jnp.stack([lp["qkv_b"].reshape(3, 1, D) for lp in layers]) # (L,3,1,D)
    out_w = jnp.stack([lp["out_w"] for lp in layers])                  # (L,D,D)
    out_b = jnp.stack([lp["out_b"].reshape(1, D) for lp in layers])
    fc1_w = jnp.stack([lp["fc1_w"] for lp in layers])                  # (L,D,d_ff)
    fc1_b = jnp.stack([lp["fc1_b"].reshape(1, -1) for lp in layers])
    fc2_w = jnp.stack([lp["fc2_w"] for lp in layers])                  # (L,d_ff,D)
    fc2_b = jnp.stack([lp["fc2_b"].reshape(1, D) for lp in layers])
    ln1_g = jnp.stack([lp["ln1_g"].reshape(1, D) for lp in layers])
    ln1_b = jnp.stack([lp["ln1_b"].reshape(1, D) for lp in layers])
    ffln_g = jnp.stack([lp["ffln_g"].reshape(1, D) for lp in layers])
    ffln_b = jnp.stack([lp["ffln_b"].reshape(1, D) for lp in layers])
    ln2_g = jnp.stack([lp["ln2_g"].reshape(1, D) for lp in layers])
    ln2_b = jnp.stack([lp["ln2_b"].reshape(1, D) for lp in layers])

    qscale = np.zeros((L, H, 1, D), np.float32)
    hmask = np.zeros((L, H, 1, D), np.float32)
    for li, head_dims in enumerate(head_dims_per_layer):
        start = 0
        for hh, dh in enumerate(head_dims):
            hmask[li, hh, 0, start:start + dh] = 1.0
            qscale[li, hh, 0, start:start + dh] = 1.0 / math.sqrt(float(dh))
            start += dh

    consts = (params["emb_w"], params["emb_b"].reshape(1, D))
    layer_stacks = (qkv_w, qkv_b, out_w, out_b, fc1_w, fc1_b, fc2_w, fc2_b,
                    ln1_g, ln1_b, ffln_g, ffln_b, ln2_g, ln2_b,
                    jnp.asarray(qscale), jnp.asarray(hmask))
    return consts, layer_stacks


def encoder_forward(params, consts, layer_stacks, x, head_dims_per_layer, *,
                    d_model, num_heads, min_dim, b_block=None,
                    use_tanh_gelu=False, approx_recip=False):
    B, T, _ = x.shape
    if b_block is None:
        b_block = _choose_b_block(B, T)
    pos = params["pos_enc"][:T]                      # (T, D)
    pos_tiled = jnp.tile(pos, (b_block, 1))          # (b_block*T, D), tiny
    emb_w, emb_b = consts
    out = encoder_forward_device(x, pos_tiled, emb_w, emb_b, layer_stacks,
                                 b_block=b_block, use_tanh_gelu=use_tanh_gelu,
                                 approx_recip=approx_recip)
    total_aux = 0.0
    for lp, hdi in zip(params["layers"], head_dims_per_layer):
        total_aux += compute_aux_loss(lp["head_logits"], hdi, d_model,
                                      num_heads, min_dim)
    return out, jnp.asarray(total_aux, dtype=jnp.float32)


# --------------------------------- main --------------------------------------

if __name__ == "__main__":
    B, T = 2, 8
    FEATURES = 6          # features_num
    D_MODEL = 64          # embedding_dim
    NUM_LAYERS = 2
    NUM_HEADS = 2
    D_FF = 128
    MAX_LEN = 512
    MIN_DIM = 16          # EncoderLayer default

    root = jax.random.PRNGKey(0)
    k_params, k_x = jax.random.split(root)
    params = init_encoder_params(k_params, FEATURES, D_MODEL, NUM_LAYERS,
                                 NUM_HEADS, D_FF, MAX_LEN)
    # Integer head widths depend only on parameters -> static (compile-time).
    head_dims_per_layer = [
        compute_head_dims_int(np.asarray(lp["head_logits"]),
                              D_MODEL, NUM_HEADS, MIN_DIM)
        for lp in params["layers"]
    ]
    consts, layer_stacks = prepare_encoder_arrays(params, head_dims_per_layer,
                                                  D_MODEL, NUM_HEADS)

    x = jax.random.normal(k_x, (B, T, FEATURES), jnp.float32)

    out, aux_loss = encoder_forward(params, consts, layer_stacks, x,
                                    head_dims_per_layer,
                                    d_model=D_MODEL, num_heads=NUM_HEADS,
                                    min_dim=MIN_DIM)
    out = jax.block_until_ready(out)
    aux_loss = jax.block_until_ready(aux_loss)
    assert out.shape == (B, T, D_MODEL)
    assert aux_loss.shape == ()
    print("KERNEL_OK")
</pallas_src>

<mosaic_0001>
module attributes {stable_mosaic.version = 11 : i64} {
  func.func @_encoder_kernel(%arg0: i32, %arg1: i32, %arg2: memref<1x8x6xf32, #tpu.memory_space<vmem>>, %arg3: memref<8x64xf32, #tpu.memory_space<vmem>>, %arg4: memref<6x64xf32, #tpu.memory_space<vmem>>, %arg5: memref<1x64xf32, #tpu.memory_space<vmem>>, %arg6: memref<1x3x64x64xf32, #tpu.memory_space<vmem>>, %arg7: memref<1x3x1x64xf32, #tpu.memory_space<vmem>>, %arg8: memref<1x64x64xf32, #tpu.memory_space<vmem>>, %arg9: memref<1x1x64xf32, #tpu.memory_space<vmem>>, %arg10: memref<1x64x128xf32, #tpu.memory_space<vmem>>, %arg11: memref<1x1x128xf32, #tpu.memory_space<vmem>>, %arg12: memref<1x128x64xf32, #tpu.memory_space<vmem>>, %arg13: memref<1x1x64xf32, #tpu.memory_space<vmem>>, %arg14: memref<1x1x64xf32, #tpu.memory_space<vmem>>, %arg15: memref<1x1x64xf32, #tpu.memory_space<vmem>>, %arg16: memref<1x1x64xf32, #tpu.memory_space<vmem>>, %arg17: memref<1x1x64xf32, #tpu.memory_space<vmem>>, %arg18: memref<1x1x64xf32, #tpu.memory_space<vmem>>, %arg19: memref<1x1x64xf32, #tpu.memory_space<vmem>>, %arg20: memref<1x2x1x64xf32, #tpu.memory_space<vmem>>, %arg21: memref<1x2x1x64xf32, #tpu.memory_space<vmem>>, %arg22: memref<1x8x64xf32, #tpu.memory_space<vmem>>, %arg23: memref<8x64xf32, #tpu.memory_space<vmem>>) attributes {dimension_semantics = [#tpu.dimension_semantics<parallel>, #tpu.dimension_semantics<arbitrary>], iteration_bounds = array<i64: 2, 2>, scalar_prefetch = 0 : i64, scratch_operands = 1 : i64, tpu.core_type = #tpu.core_type<tc>, window_params = [{transform_indices = @transform_0, window_bounds = array<i64: 1, 8, 6>}, {pipeline_mode = #tpu.pipeline_mode<synchronous>, transform_indices = @transform_1, window_bounds = array<i64: 8, 64>}, {pipeline_mode = #tpu.pipeline_mode<synchronous>, transform_indices = @transform_2, window_bounds = array<i64: 6, 64>}, {pipeline_mode = #tpu.pipeline_mode<synchronous>, transform_indices = @transform_3, window_bounds = array<i64: 1, 64>}, {transform_indices = @transform_4, window_bounds = array<i64: 1, 3, 64, 64>}, {transform_indices = @transform_5, window_bounds = array<i64: 1, 3, 1, 64>}, {transform_indices = @transform_6, window_bounds = array<i64: 1, 64, 64>}, {transform_indices = @transform_7, window_bounds = array<i64: 1, 1, 64>}, {transform_indices = @transform_8, window_bounds = array<i64: 1, 64, 128>}, {transform_indices = @transform_9, window_bounds = array<i64: 1, 1, 128>}, {transform_indices = @transform_10, window_bounds = array<i64: 1, 128, 64>}, {transform_indices = @transform_11, window_bounds = array<i64: 1, 1, 64>}, {transform_indices = @transform_12, window_bounds = array<i64: 1, 1, 64>}, {transform_indices = @transform_13, window_bounds = array<i64: 1, 1, 64>}, {transform_indices = @transform_14, window_bounds = array<i64: 1, 1, 64>}, {transform_indices = @transform_15, window_bounds = array<i64: 1, 1, 64>}, {transform_indices = @transform_16, window_bounds = array<i64: 1, 1, 64>}, {transform_indices = @transform_17, window_bounds = array<i64: 1, 1, 64>}, {transform_indices = @transform_18, window_bounds = array<i64: 1, 2, 1, 64>}, {transform_indices = @transform_19, window_bounds = array<i64: 1, 2, 1, 64>}, {transform_indices = @transform_20, window_bounds = array<i64: 1, 8, 64>}]} {
    %cst = arith.constant 1.000000e+00 : f32
    %0 = vector.broadcast %cst : f32 to vector<64x1xf32>
    %cst_0 = arith.constant 1.000000e+00 : f32
    %1 = vector.broadcast %cst_0 : f32 to vector<8x1xf32>
    %c0_i32 = arith.constant 0 : i32
    %2 = arith.cmpi eq, %arg1, %c0_i32 : i32
    %3 = arith.extui %2 : i1 to i32
    %c0_i32_1 = arith.constant 0 : i32
    %4 = arith.cmpi ne, %3, %c0_i32_1 : i32
    scf.if %4 {
      %c0_114 = arith.constant 0 : index
      %c0_115 = arith.constant 0 : index
      %c0_116 = arith.constant 0 : index
      %198 = vector.load %arg2[%c0_114, %c0_115, %c0_116] : memref<1x8x6xf32, #tpu.memory_space<vmem>>, vector<1x8x6xf32>
      %199 = vector.shape_cast %198 : vector<1x8x6xf32> to vector<8x6xf32>
      %c0_117 = arith.constant 0 : index
      %c0_118 = arith.constant 0 : index
      %200 = vector.load %arg4[%c0_117, %c0_118] : memref<6x64xf32, #tpu.memory_space<vmem>>, vector<6x64xf32>
      %cst_119 = arith.constant dense<0.000000e+00> : vector<8x64xf32>
      %201 = tpu.matmul %199, %200, %cst_119 {dimension_numbers = #tpu.dot_dimension_numbers<[1], [0], [0], [1], [0, 0, 1, 1], [], []>} : vector<8x6xf32>, vector<6x64xf32>, vector<8x64xf32> -> vector<8x64xf32>
      %c0_120 = arith.constant 0 : index
      %c0_121 = arith.constant 0 : index
      %202 = vector.load %arg5[%c0_120, %c0_121] : memref<1x64xf32, #tpu.memory_space<vmem>>, vector<1x64xf32>
      %203 = vector.broadcast %202 : vector<1x64xf32> to vector<8x64xf32>
      %204 = arith.addf %201, %203 : vector<8x64xf32>
      %c0_122 = arith.constant 0 : index
      %c0_123 = arith.constant 0 : index
      %205 = vector.load %arg3[%c0_122, %c0_123] : memref<8x64xf32, #tpu.memory_space<vmem>>, vector<8x64xf32>
      %206 = arith.addf %204, %205 : vector<8x64xf32>
      %c0_124 = arith.constant 0 : index
      %c0_125 = arith.constant 0 : index
      %207 = vector.load %arg23[%c0_124, %c0_125] : memref<8x64xf32, #tpu.memory_space<vmem>>, vector<8x64xf32>
      tpu.vector_store %arg23[%c0_124, %c0_125], %206 {strides = array<i32>} : memref<8x64xf32, #tpu.memory_space<vmem>>, vector<8x64xf32>,
    } else {
    }
    %c0 = arith.constant 0 : index
    %c0_2 = arith.constant 0 : index
    %5 = vector.load %arg23[%c0, %c0_2] : memref<8x64xf32, #tpu.memory_space<vmem>>, vector<8x64xf32>
    %c0_3 = arith.constant 0 : index
    %c0_4 = arith.constant 0 : index
    %c0_5 = arith.constant 0 : index
    %c0_6 = arith.constant 0 : index
    %6 = vector.load %arg6[%c0_3, %c0_4, %c0_5, %c0_6] : memref<1x3x64x64xf32, #tpu.memory_space<vmem>>, vector<1x1x64x64xf32>
    %7 = vector.shape_cast %6 : vector<1x1x64x64xf32> to vector<64x64xf32>
    %cst_7 = arith.constant dense<0.000000e+00> : vector<8x64xf32>
    %8 = tpu.matmul %5, %7, %cst_7 {dimension_numbers = #tpu.dot_dimension_numbers<[1], [0], [0], [1], [0, 0, 1, 1], [], []>} : vector<8x64xf32>, vector<64x64xf32>, vector<8x64xf32> -> vector<8x64xf32>
    %c0_8 = arith.constant 0 : index
    %c0_9 = arith.constant 0 : index
    %c0_10 = arith.constant 0 : index
    %c0_11 = arith.constant 0 : index
    %9 = vector.load %arg7[%c0_8, %c0_9, %c0_10, %c0_11] : memref<1x3x1x64xf32, #tpu.memory_space<vmem>>, vector<1x1x1x64xf32>
    %10 = vector.shape_cast %9 : vector<1x1x1x64xf32> to vector<1x64xf32>
    %11 = vector.broadcast %10 : vector<1x64xf32> to vector<8x64xf32>
    %12 = arith.addf %8, %11 : vector<8x64xf32>
    %c0_12 = arith.constant 0 : index
    %c1 = arith.constant 1 : index
    %c0_13 = arith.constant 0 : index
    %c0_14 = arith.constant 0 : index
    %13 = vector.load %arg6[%c0_12, %c1, %c0_13, %c0_14] : memref<1x3x64x64xf32, #tpu.memory_space<vmem>>, vector<1x1x64x64xf32>
    %14 = vector.shape_cast %13 : vector<1x1x64x64xf32> to vector<64x64xf32>
    %cst_15 = arith.constant dense<0.000000e+00> : vector<8x64xf32>
    %15 = tpu.matmul %5, %14, %cst_15 {dimension_numbers = #tpu.dot_dimension_numbers<[1], [0], [0], [1], [0, 0, 1, 1], [], []>} : vector<8x64xf32>, vector<64x64xf32>, vector<8x64xf32> -> vector<8x64xf32>
    %c0_16 = arith.constant 0 : index
    %c1_17 = arith.constant 1 : index
    %c0_18 = arith.constant 0 : index
    %c0_19 = arith.constant 0 : index
    %16 = vector.load %arg7[%c0_16, %c1_17, %c0_18, %c0_19] : memref<1x3x1x64xf32, #tpu.memory_space<vmem>>, vector<1x1x1x64xf32>
    %17 = vector.shape_cast %16 : vector<1x1x1x64xf32> to vector<1x64xf32>
    %18 = vector.broadcast %17 : vector<1x64xf32> to vector<8x64xf32>
    %19 = arith.addf %15, %18 : vector<8x64xf32>
    %c0_20 = arith.constant 0 : index
    %c2 = arith.constant 2 : index
    %c0_21 = arith.constant 0 : index
    %c0_22 = arith.constant 0 : index
    %20 = vector.load %arg6[%c0_20, %c2, %c0_21, %c0_22] : memref<1x3x64x64xf32, #tpu.memory_space<vmem>>, vector<1x1x64x64xf32>
    %21 = vector.shape_cast %20 : vector<1x1x64x64xf32> to vector<64x64xf32>
    %cst_23 = arith.constant dense<0.000000e+00> : vector<8x64xf32>
    %22 = tpu.matmul %5, %21, %cst_23 {dimension_numbers = #tpu.dot_dimension_numbers<[1], [0], [0], [1], [0, 0, 1, 1], [], []>} : vector<8x64xf32>, vector<64x64xf32>, vector<8x64xf32> -> vector<8x64xf32>
    %c0_24 = arith.constant 0 : index
    %c2_25 = arith.constant 2 : index
    %c0_26 = arith.constant 0 : index
    %c0_27 = arith.constant 0 : index
    %23 = vector.load %arg7[%c0_24, %c2_25, %c0_26, %c0_27] : memref<1x3x1x64xf32, #tpu.memory_space<vmem>>, vector<1x1x1x64xf32>
    %24 = vector.shape_cast %23 : vector<1x1x1x64xf32> to vector<1x64xf32>
    %25 = vector.broadcast %24 : vector<1x64xf32> to vector<8x64xf32>
    %26 = arith.addf %22, %25 : vector<8x64xf32>
    %c0_28 = arith.constant 0 : index
    %c0_29 = arith.constant 0 : index
    %c0_30 = arith.constant 0 : index
    %c0_31 = arith.constant 0 : index
    %27 = vector.load %arg20[%c0_28, %c0_29, %c0_30, %c0_31] : memref<1x2x1x64xf32, #tpu.memory_space<vmem>>, vector<1x2x1x64xf32>
    %28 = vector.shape_cast %27 : vector<1x2x1x64xf32> to vector<2x1x64xf32>
    %c0_32 = arith.constant 0 : index
    %c0_33 = arith.constant 0 : index
    %c0_34 = arith.constant 0 : index
    %c0_35 = arith.constant 0 : index
    %29 = vector.load %arg21[%c0_32, %c0_33, %c0_34, %c0_35] : memref<1x2x1x64xf32, #tpu.memory_space<vmem>>, vector<1x2x1x64xf32>
    %30 = vector.shape_cast %29 : vector<1x2x1x64xf32> to vector<2x1x64xf32>
    %31 = vector.extract_strided_slice %28 {offsets = [0, 0, 0], sizes = [1, 1, 64], strides = [1, 1, 1]} : vector<2x1x64xf32> to vector<1x1x64xf32>
    %32 = vector.shape_cast %31 : vector<1x1x64xf32> to vector<1x64xf32>
    %33 = vector.broadcast %32 : vector<1x64xf32> to vector<8x64xf32>
    %34 = arith.mulf %12, %33 : vector<8x64xf32>
    %35 = vector.extract_strided_slice %28 {offsets = [1, 0, 0], sizes = [1, 1, 64], strides = [1, 1, 1]} : vector<2x1x64xf32> to vector<1x1x64xf32>
    %36 = vector.shape_cast %35 : vector<1x1x64xf32> to vector<1x64xf32>
    %37 = vector.broadcast %36 : vector<1x64xf32> to vector<8x64xf32>
    %38 = arith.mulf %12, %37 : vector<8x64xf32>
    %39 = tpu.concatenate %34, %38 in 0 : vector<8x64xf32>, vector<8x64xf32> -> vector<16x64xf32>
    %cst_36 = arith.constant dense<0.000000e+00> : vector<16x8xf32>
    %40 = tpu.matmul %39, %19, %cst_36 {dimension_numbers = #tpu.dot_dimension_numbers<[1], [1], [0], [0], [0, 0, 1, 0], [], []>} : vector<16x64xf32>, vector<8x64xf32>, vector<16x8xf32> -> vector<16x8xf32>
    %cst_37 = arith.constant dense<0xFF800000> : vector<16xf32>
    %41 = vector.multi_reduction <maximumf>, %40, %cst_37 [1] : vector<16x8xf32> to vector<16xf32>
    %42 = vector.shape_cast %41 : vector<16xf32> to vector<16x1xf32>
    %43 = vector.broadcast %42 : vector<16x1xf32> to vector<16x8xf32>
    %44 = arith.subf %40, %43 : vector<16x8xf32>
    %45 = math.exp %44 : vector<16x8xf32>
    %cst_38 = arith.constant dense<0.000000e+00> : vector<16x1xf32>
    %46 = tpu.matmul %45, %1, %cst_38 {dimension_numbers = #tpu.dot_dimension_numbers<[1], [0], [0], [1], [0, 0, 1, 1], [], []>} : vector<16x8xf32>, vector<8x1xf32>, vector<16x1xf32> -> vector<16x1xf32>
    %cst_39 = arith.constant 1.000000e+00 : f32
    %47 = vector.broadcast %cst_39 : f32 to vector<16x1xf32>
    %48 = arith.divf %47, %46 : vector<16x1xf32>
    %49 = vector.broadcast %48 : vector<16x1xf32> to vector<16x8xf32>
    %50 = arith.mulf %45, %49 : vector<16x8xf32>
    %cst_40 = arith.constant dense<0.000000e+00> : vector<16x64xf32>
    %51 = tpu.matmul %50, %26, %cst_40 {dimension_numbers = #tpu.dot_dimension_numbers<[1], [0], [0], [1], [0, 0, 1, 1], [], []>} : vector<16x8xf32>, vector<8x64xf32>, vector<16x64xf32> -> vector<16x64xf32>
    %52 = vector.extract_strided_slice %51 {offsets = [0, 0], sizes = [8, 64], strides = [1, 1]} : vector<16x64xf32> to vector<8x64xf32>
    %53 = vector.extract_strided_slice %30 {offsets = [0, 0, 0], sizes = [1, 1, 64], strides = [1, 1, 1]} : vector<2x1x64xf32> to vector<1x1x64xf32>
    %54 = vector.shape_cast %53 : vector<1x1x64xf32> to vector<1x64xf32>
    %55 = vector.broadcast %54 : vector<1x64xf32> to vector<8x64xf32>
    %56 = arith.mulf %52, %55 : vector<8x64xf32>
    %57 = vector.extract_strided_slice %51 {offsets = [8, 0], sizes = [8, 64], strides = [1, 1]} : vector<16x64xf32> to vector<8x64xf32>
    %58 = vector.extract_strided_slice %30 {offsets = [1, 0, 0], sizes = [1, 1, 64], strides = [1, 1, 1]} : vector<2x1x64xf32> to vector<1x1x64xf32>
    %59 = vector.shape_cast %58 : vector<1x1x64xf32> to vector<1x64xf32>
    %60 = vector.broadcast %59 : vector<1x64xf32> to vector<8x64xf32>
    %61 = arith.mulf %57, %60 : vector<8x64xf32>
    %62 = arith.addf %56, %61 : vector<8x64xf32>
    %c0_41 = arith.constant 0 : index
    %c0_42 = arith.constant 0 : index
    %c0_43 = arith.constant 0 : index
    %63 = vector.load %arg8[%c0_41, %c0_42, %c0_43] : memref<1x64x64xf32, #tpu.memory_space<vmem>>, vector<1x64x64xf32>
    %64 = vector.shape_cast %63 : vector<1x64x64xf32> to vector<64x64xf32>
    %cst_44 = arith.constant dense<0.000000e+00> : vector<8x64xf32>
    %65 = tpu.matmul %62, %64, %cst_44 {dimension_numbers = #tpu.dot_dimension_numbers<[1], [0], [0], [1], [0, 0, 1, 1], [], []>} : vector<8x64xf32>, vector<64x64xf32>, vector<8x64xf32> -> vector<8x64xf32>
    %c0_45 = arith.constant 0 : index
    %c0_46 = arith.constant 0 : index
    %c0_47 = arith.constant 0 : index
    %66 = vector.load %arg9[%c0_45, %c0_46, %c0_47] : memref<1x1x64xf32, #tpu.memory_space<vmem>>, vector<1x1x64xf32>
    %67 = vector.shape_cast %66 : vector<1x1x64xf32> to vector<1x64xf32>
    %68 = vector.broadcast %67 : vector<1x64xf32> to vector<8x64xf32>
    %69 = arith.addf %65, %68 : vector<8x64xf32>
    %70 = arith.addf %5, %69 : vector<8x64xf32>
    %c0_48 = arith.constant 0 : index
    %c0_49 = arith.constant 0 : index
    %c0_50 = arith.constant 0 : index
    %71 = vector.load %arg14[%c0_48, %c0_49, %c0_50] : memref<1x1x64xf32, #tpu.memory_space<vmem>>, vector<1x1x64xf32>
    %72 = vector.shape_cast %71 : vector<1x1x64xf32> to vector<1x64xf32>
    %c0_51 = arith.constant 0 : index
    %c0_52 = arith.constant 0 : index
    %c0_53 = arith.constant 0 : index
    %73 = vector.load %arg15[%c0_51, %c0_52, %c0_53] : memref<1x1x64xf32, #tpu.memory_space<vmem>>, vector<1x1x64xf32>
    %74 = vector.shape_cast %73 : vector<1x1x64xf32> to vector<1x64xf32>
    %cst_54 = arith.constant dense<0.000000e+00> : vector<8x1xf32>
    %75 = tpu.matmul %70, %0, %cst_54 {dimension_numbers = #tpu.dot_dimension_numbers<[1], [0], [0], [1], [0, 0, 1, 1], [], []>} : vector<8x64xf32>, vector<64x1xf32>, vector<8x1xf32> -> vector<8x1xf32>
    %cst_55 = arith.constant 1.562500e-02 : f32
    %76 = vector.broadcast %cst_55 : f32 to vector<8x1xf32>
    %77 = arith.mulf %75, %76 : vector<8x1xf32>
    %78 = vector.broadcast %77 : vector<8x1xf32> to vector<8x64xf32>
    %79 = arith.subf %70, %78 : vector<8x64xf32>
    %80 = arith.mulf %79, %79 : vector<8x64xf32>
    %cst_56 = arith.constant dense<0.000000e+00> : vector<8x1xf32>
    %81 = tpu.matmul %80, %0, %cst_56 {dimension_numbers = #tpu.dot_dimension_numbers<[1], [0], [0], [1], [0, 0, 1, 1], [], []>} : vector<8x64xf32>, vector<64x1xf32>, vector<8x1xf32> -> vector<8x1xf32>
    %cst_57 = arith.constant 1.562500e-02 : f32
    %82 = vector.broadcast %cst_57 : f32 to vector<8x1xf32>
    %83 = arith.mulf %81, %82 : vector<8x1xf32>
    %cst_58 = arith.constant 9.99999974E-6 : f32
    %84 = vector.broadcast %cst_58 : f32 to vector<8x1xf32>
    %85 = arith.addf %83, %84 : vector<8x1xf32>
    %86 = math.rsqrt %85 : vector<8x1xf32>
    %87 = vector.broadcast %86 : vector<8x1xf32> to vector<8x64xf32>
    %88 = arith.mulf %79, %87 : vector<8x64xf32>
    %89 = vector.broadcast %72 : vector<1x64xf32> to vector<8x64xf32>
    %90 = arith.mulf %88, %89 : vector<8x64xf32>
    %91 = vector.broadcast %74 : vector<1x64xf32> to vector<8x64xf32>
    %92 = arith.addf %90, %91 : vector<8x64xf32>
    %c0_59 = arith.constant 0 : index
    %c0_60 = arith.constant 0 : index
    %c0_61 = arith.constant 0 : index
    %93 = vector.load %arg10[%c0_59, %c0_60, %c0_61] : memref<1x64x128xf32, #tpu.memory_space<vmem>>, vector<1x64x128xf32>
    %94 = vector.shape_cast %93 : vector<1x64x128xf32> to vector<64x128xf32>
    %cst_62 = arith.constant dense<0.000000e+00> : vector<8x128xf32>
    %95 = tpu.matmul %92, %94, %cst_62 {dimension_numbers = #tpu.dot_dimension_numbers<[1], [0], [0], [1], [0, 0, 1, 1], [], []>} : vector<8x64xf32>, vector<64x128xf32>, vector<8x128xf32> -> vector<8x128xf32>
    %c0_63 = arith.constant 0 : index
    %c0_64 = arith.constant 0 : index
    %c0_65 = arith.constant 0 : index
    %96 = vector.load %arg11[%c0_63, %c0_64, %c0_65] : memref<1x1x128xf32, #tpu.memory_space<vmem>>, vector<1x1x128xf32>
    %97 = vector.shape_cast %96 : vector<1x1x128xf32> to vector<1x128xf32>
    %98 = vector.broadcast %97 : vector<1x128xf32> to vector<8x128xf32>
    %99 = arith.addf %95, %98 : vector<8x128xf32>
    %cst_66 = arith.constant 5.000000e-01 : f32
    %100 = vector.broadcast %cst_66 : f32 to vector<8x128xf32>
    %101 = arith.mulf %100, %99 : vector<8x128xf32>
    %cst_67 = arith.constant 0.707106769 : f32
    %102 = vector.broadcast %cst_67 : f32 to vector<8x128xf32>
    %103 = arith.mulf %99, %102 : vector<8x128xf32>
    %cst_68 = arith.constant 0.000000e+00 : f32
    %104 = vector.broadcast %cst_68 : f32 to vector<8x128xf32>
    %105 = arith.cmpf olt, %103, %104 : vector<8x128xf32>
    %cst_69 = arith.constant -1.000000e+00 : f32
    %cst_70 = arith.constant 1.000000e+00 : f32
    %106 = vector.broadcast %cst_69 : f32 to vector<8x128xf32>
    %107 = vector.broadcast %cst_70 : f32 to vector<8x128xf32>
    %108 = arith.select %105, %106, %107 : vector<8x128xi1>, vector<8x128xf32>
    %109 = math.absf %103 : vector<8x128xf32>
    %cst_71 = arith.constant 0.327591091 : f32
    %110 = vector.broadcast %cst_71 : f32 to vector<8x128xf32>
    %111 = arith.mulf %110, %109 : vector<8x128xf32>
    %cst_72 = arith.constant 1.000000e+00 : f32
    %112 = vector.broadcast %cst_72 : f32 to vector<8x128xf32>
    %113 = arith.addf %112, %111 : vector<8x128xf32>
    %cst_73 = arith.constant 1.000000e+00 : f32
    %114 = vector.broadcast %cst_73 : f32 to vector<8x128xf32>
    %115 = arith.divf %114, %113 : vector<8x128xf32>
    %cst_74 = arith.constant 1.06140542 : f32
    %116 = vector.broadcast %cst_74 : f32 to vector<8x128xf32>
    %117 = arith.mulf %116, %115 : vector<8x128xf32>
    %cst_75 = arith.constant -1.45315206 : f32
    %118 = vector.broadcast %cst_75 : f32 to vector<8x128xf32>
    %119 = arith.addf %117, %118 : vector<8x128xf32>
    %120 = arith.mulf %119, %115 : vector<8x128xf32>
    %cst_76 = arith.constant 1.42141378 : f32
    %121 = vector.broadcast %cst_76 : f32 to vector<8x128xf32>
    %122 = arith.addf %120, %121 : vector<8x128xf32>
    %123 = arith.mulf %122, %115 : vector<8x128xf32>
    %cst_77 = arith.constant -0.284496725 : f32
    %124 = vector.broadcast %cst_77 : f32 to vector<8x128xf32>
    %125 = arith.addf %123, %124 : vector<8x128xf32>
    %126 = arith.mulf %125, %115 : vector<8x128xf32>
    %cst_78 = arith.constant 0.254829586 : f32
    %127 = vector.broadcast %cst_78 : f32 to vector<8x128xf32>
    %128 = arith.addf %126, %127 : vector<8x128xf32>
    %129 = arith.mulf %128, %115 : vector<8x128xf32>
    %cst_79 = arith.constant 0.000000e+00 : f32
    %130 = vector.broadcast %cst_79 : f32 to vector<8x128xf32>
    %131 = arith.subf %130, %109 : vector<8x128xf32>
    %132 = arith.mulf %131, %109 : vector<8x128xf32>
    %133 = math.exp %132 : vector<8x128xf32>
    %134 = arith.mulf %129, %133 : vector<8x128xf32>
    %cst_80 = arith.constant 1.000000e+00 : f32
    %135 = vector.broadcast %cst_80 : f32 to vector<8x128xf32>
    %136 = arith.subf %135, %134 : vector<8x128xf32>
    %137 = arith.mulf %108, %136 : vector<8x128xf32>
    %cst_81 = arith.constant 1.000000e+00 : f32
    %138 = vector.broadcast %cst_81 : f32 to vector<8x128xf32>
    %139 = arith.addf %138, %137 : vector<8x128xf32>
    %140 = arith.mulf %101, %139 : vector<8x128xf32>
    %c0_82 = arith.constant 0 : index
    %c0_83 = arith.constant 0 : index
    %c0_84 = arith.constant 0 : index
    %141 = vector.load %arg12[%c0_82, %c0_83, %c0_84] : memref<1x128x64xf32, #tpu.memory_space<vmem>>, vector<1x128x64xf32>
    %142 = vector.shape_cast %141 : vector<1x128x64xf32> to vector<128x64xf32>
    %cst_85 = arith.constant dense<0.000000e+00> : vector<8x64xf32>
    %143 = tpu.matmul %140, %142, %cst_85 {dimension_numbers = #tpu.dot_dimension_numbers<[1], [0], [0], [1], [0, 0, 1, 1], [], []>} : vector<8x128xf32>, vector<128x64xf32>, vector<8x64xf32> -> vector<8x64xf32>
    %c0_86 = arith.constant 0 : index
    %c0_87 = arith.constant 0 : index
    %c0_88 = arith.constant 0 : index
    %144 = vector.load %arg13[%c0_86, %c0_87, %c0_88] : memref<1x1x64xf32, #tpu.memory_space<vmem>>, vector<1x1x64xf32>
    %145 = vector.shape_cast %144 : vector<1x1x64xf32> to vector<1x64xf32>
    %146 = vector.broadcast %145 : vector<1x64xf32> to vector<8x64xf32>
    %147 = arith.addf %143, %146 : vector<8x64xf32>
    %148 = arith.addf %147, %92 : vector<8x64xf32>
    %c0_89 = arith.constant 0 : index
    %c0_90 = arith.constant 0 : index
    %c0_91 = arith.constant 0 : index
    %149 = vector.load %arg16[%c0_89, %c0_90, %c0_91] : memref<1x1x64xf32, #tpu.memory_space<vmem>>, vector<1x1x64xf32>
    %150 = vector.shape_cast %149 : vector<1x1x64xf32> to vector<1x64xf32>
    %c0_92 = arith.constant 0 : index
    %c0_93 = arith.constant 0 : index
    %c0_94 = arith.constant 0 : index
    %151 = vector.load %arg17[%c0_92, %c0_93, %c0_94] : memref<1x1x64xf32, #tpu.memory_space<vmem>>, vector<1x1x64xf32>
    %152 = vector.shape_cast %151 : vector<1x1x64xf32> to vector<1x64xf32>
    %cst_95 = arith.constant dense<0.000000e+00> : vector<8x1xf32>
    %153 = tpu.matmul %148, %0, %cst_95 {dimension_numbers = #tpu.dot_dimension_numbers<[1], [0], [0], [1], [0, 0, 1, 1], [], []>} : vector<8x64xf32>, vector<64x1xf32>, vector<8x1xf32> -> vector<8x1xf32>
    %cst_96 = arith.constant 1.562500e-02 : f32
    %154 = vector.broadcast %cst_96 : f32 to vector<8x1xf32>
    %155 = arith.mulf %153, %154 : vector<8x1xf32>
    %156 = vector.broadcast %155 : vector<8x1xf32> to vector<8x64xf32>
    %157 = arith.subf %148, %156 : vector<8x64xf32>
    %158 = arith.mulf %157, %157 : vector<8x64xf32>
    %cst_97 = arith.constant dense<0.000000e+00> : vector<8x1xf32>
    %159 = tpu.matmul %158, %0, %cst_97 {dimension_numbers = #tpu.dot_dimension_numbers<[1], [0], [0], [1], [0, 0, 1, 1], [], []>} : vector<8x64xf32>, vector<64x1xf32>, vector<8x1xf32> -> vector<8x1xf32>
    %cst_98 = arith.constant 1.562500e-02 : f32
    %160 = vector.broadcast %cst_98 : f32 to vector<8x1xf32>
    %161 = arith.mulf %159, %160 : vector<8x1xf32>
    %cst_99 = arith.constant 9.99999974E-6 : f32
    %162 = vector.broadcast %cst_99 : f32 to vector<8x1xf32>
    %163 = arith.addf %161, %162 : vector<8x1xf32>
    %164 = math.rsqrt %163 : vector<8x1xf32>
    %165 = vector.broadcast %164 : vector<8x1xf32> to vector<8x64xf32>
    %166 = arith.mulf %157, %165 : vector<8x64xf32>
    %167 = vector.broadcast %150 : vector<1x64xf32> to vector<8x64xf32>
    %168 = arith.mulf %166, %167 : vector<8x64xf32>
    %169 = vector.broadcast %152 : vector<1x64xf32> to vector<8x64xf32>
    %170 = arith.addf %168, %169 : vector<8x64xf32>
    %171 = arith.addf %92, %170 : vector<8x64xf32>
    %c0_100 = arith.constant 0 : index
    %c0_101 = arith.constant 0 : index
    %c0_102 = arith.constant 0 : index
    %172 = vector.load %arg18[%c0_100, %c0_101, %c0_102] : memref<1x1x64xf32, #tpu.memory_space<vmem>>, vector<1x1x64xf32>
    %173 = vector.shape_cast %172 : vector<1x1x64xf32> to vector<1x64xf32>
    %c0_103 = arith.constant 0 : index
    %c0_104 = arith.constant 0 : index
    %c0_105 = arith.constant 0 : index
    %174 = vector.load %arg19[%c0_103, %c0_104, %c0_105] : memref<1x1x64xf32, #tpu.memory_space<vmem>>, vector<1x1x64xf32>
    %175 = vector.shape_cast %174 : vector<1x1x64xf32> to vector<1x64xf32>
    %cst_106 = arith.constant dense<0.000000e+00> : vector<8x1xf32>
    %176 = tpu.matmul %171, %0, %cst_106 {dimension_numbers = #tpu.dot_dimension_numbers<[1], [0], [0], [1], [0, 0, 1, 1], [], []>} : vector<8x64xf32>, vector<64x1xf32>, vector<8x1xf32> -> vector<8x1xf32>
    %cst_107 = arith.constant 1.562500e-02 : f32
    %177 = vector.broadcast %cst_107 : f32 to vector<8x1xf32>
    %178 = arith.mulf %176, %177 : vector<8x1xf32>
    %179 = vector.broadcast %178 : vector<8x1xf32> to vector<8x64xf32>
    %180 = arith.subf %171, %179 : vector<8x64xf32>
    %181 = arith.mulf %180, %180 : vector<8x64xf32>
    %cst_108 = arith.constant dense<0.000000e+00> : vector<8x1xf32>
    %182 = tpu.matmul %181, %0, %cst_108 {dimension_numbers = #tpu.dot_dimension_numbers<[1], [0], [0], [1], [0, 0, 1, 1], [], []>} : vector<8x64xf32>, vector<64x1xf32>, vector<8x1xf32> -> vector<8x1xf32>
    %cst_109 = arith.constant 1.562500e-02 : f32
    %183 = vector.broadcast %cst_109 : f32 to vector<8x1xf32>
    %184 = arith.mulf %182, %183 : vector<8x1xf32>
    %cst_110 = arith.constant 9.99999974E-6 : f32
    %185 = vector.broadcast %cst_110 : f32 to vector<8x1xf32>
    %186 = arith.addf %184, %185 : vector<8x1xf32>
    %187 = math.rsqrt %186 : vector<8x1xf32>
    %188 = vector.broadcast %187 : vector<8x1xf32> to vector<8x64xf32>
    %189 = arith.mulf %180, %188 : vector<8x64xf32>
    %190 = vector.broadcast %173 : vector<1x64xf32> to vector<8x64xf32>
    %191 = arith.mulf %189, %190 : vector<8x64xf32>
    %192 = vector.broadcast %175 : vector<1x64xf32> to vector<8x64xf32>
    %193 = arith.addf %191, %192 : vector<8x64xf32>
    %c0_111 = arith.constant 0 : index
    %c0_112 = arith.constant 0 : index
    %194 = vector.load %arg23[%c0_111, %c0_112] : memref<8x64xf32, #tpu.memory_space<vmem>>, vector<8x64xf32>
    tpu.vector_store %arg23[%c0_111, %c0_112], %193 {strides = array<i32>} : memref<8x64xf32, #tpu.memory_space<vmem>>, vector<8x64xf32>,
    %c1_i32 = arith.constant 1 : i32
    %195 = arith.cmpi eq, %arg1, %c1_i32 : i32
    %196 = arith.extui %195 : i1 to i32
    %c0_i32_113 = arith.constant 0 : i32
    %197 = arith.cmpi ne, %196, %c0_i32_113 : i32
    scf.if %197 {
      %198 = vector.shape_cast %193 : vector<8x64xf32> to vector<1x8x64xf32>
      %c0_114 = arith.constant 0 : index
      %c0_115 = arith.constant 0 : index
      %c0_116 = arith.constant 0 : index
      %199 = vector.load %arg22[%c0_114, %c0_115, %c0_116] : memref<1x8x64xf32, #tpu.memory_space<vmem>>, vector<1x8x64xf32>
      tpu.vector_store %arg22[%c0_114, %c0_115, %c0_116], %198 {strides = array<i32>} : memref<1x8x64xf32, #tpu.memory_space<vmem>>, vector<1x8x64xf32>,
    } else {
    }
    return
  }
  func.func @transform_0(%arg0: i32, %arg1: i32) -> (i32, i32, i32) {
    %c0_i32 = arith.constant 0 : i32
    %c0_i32_0 = arith.constant 0 : i32
    %c0_i32_1 = arith.constant 0 : i32
    return %arg0, %c0_i32, %c0_i32_0 : i32, i32, i32
  }
  func.func @transform_1(%arg0: i32, %arg1: i32) -> (i32, i32) {
    %c0_i32 = arith.constant 0 : i32
    %c0_i32_0 = arith.constant 0 : i32
    %c0_i32_1 = arith.constant 0 : i32
    return %c0_i32, %c0_i32_0 : i32, i32
  }
  func.func @transform_2(%arg0: i32, %arg1: i32) -> (i32, i32) {
    %c0_i32 = arith.constant 0 : i32
    %c0_i32_0 = arith.constant 0 : i32
    %c0_i32_1 = arith.constant 0 : i32
    return %c0_i32, %c0_i32_0 : i32, i32
  }
  func.func @transform_3(%arg0: i32, %arg1: i32) -> (i32, i32) {
    %c0_i32 = arith.constant 0 : i32
    %c0_i32_0 = arith.constant 0 : i32
    %c0_i32_1 = arith.constant 0 : i32
    return %c0_i32, %c0_i32_0 : i32, i32
  }
  func.func @transform_4(%arg0: i32, %arg1: i32) -> (i32, i32, i32, i32) {
    %c0_i32 = arith.constant 0 : i32
    %c0_i32_0 = arith.constant 0 : i32
    %c0_i32_1 = arith.constant 0 : i32
    %c0_i32_2 = arith.constant 0 : i32
    return %arg1, %c0_i32, %c0_i32_0, %c0_i32_1 : i32, i32, i32, i32
  }
  func.func @transform_5(%arg0: i32, %arg1: i32) -> (i32, i32, i32, i32) {
    %c0_i32 = arith.constant 0 : i32
    %c0_i32_0 = arith.constant 0 : i32
    %c0_i32_1 = arith.constant 0 : i32
    %c0_i32_2 = arith.constant 0 : i32
    return %arg1, %c0_i32, %c0_i32_0, %c0_i32_1 : i32, i32, i32, i32
  }
  func.func @transform_6(%arg0: i32, %arg1: i32) -> (i32, i32, i32) {
    %c0_i32 = arith.constant 0 : i32
    %c0_i32_0 = arith.constant 0 : i32
    %c0_i32_1 = arith.constant 0 : i32
    return %arg1, %c0_i32, %c0_i32_0 : i32, i32, i32
  }
  func.func @transform_7(%arg0: i32, %arg1: i32) -> (i32, i32, i32) {
    %c0_i32 = arith.constant 0 : i32
    %c0_i32_0 = arith.constant 0 : i32
    %c0_i32_1 = arith.constant 0 : i32
    return %arg1, %c0_i32, %c0_i32_0 : i32, i32, i32
  }
  func.func @transform_8(%arg0: i32, %arg1: i32) -> (i32, i32, i32) {
    %c0_i32 = arith.constant 0 : i32
    %c0_i32_0 = arith.constant 0 : i32
    %c0_i32_1 = arith.constant 0 : i32
    return %arg1, %c0_i32, %c0_i32_0 : i32, i32, i32
  }
  func.func @transform_9(%arg0: i32, %arg1: i32) -> (i32, i32, i32) {
    %c0_i32 = arith.constant 0 : i32
    %c0_i32_0 = arith.constant 0 : i32
    %c0_i32_1 = arith.constant 0 : i32
    return %arg1, %c0_i32, %c0_i32_0 : i32, i32, i32
  }
  func.func @transform_10(%arg0: i32, %arg1: i32) -> (i32, i32, i32) {
    %c0_i32 = arith.constant 0 : i32
    %c0_i32_0 = arith.constant 0 : i32
    %c0_i32_1 = arith.constant 0 : i32
    return %arg1, %c0_i32, %c0_i32_0 : i32, i32, i32
  }
  func.func @transform_11(%arg0: i32, %arg1: i32) -> (i32, i32, i32) {
    %c0_i32 = arith.constant 0 : i32
    %c0_i32_0 = arith.constant 0 : i32
    %c0_i32_1 = arith.constant 0 : i32
    return %arg1, %c0_i32, %c0_i32_0 : i32, i32, i32
  }
  func.func @transform_12(%arg0: i32, %arg1: i32) -> (i32, i32, i32) {
    %c0_i32 = arith.constant 0 : i32
    %c0_i32_0 = arith.constant 0 : i32
    %c0_i32_1 = arith.constant 0 : i32
    return %arg1, %c0_i32, %c0_i32_0 : i32, i32, i32
  }
  func.func @transform_13(%arg0: i32, %arg1: i32) -> (i32, i32, i32) {
    %c0_i32 = arith.constant 0 : i32
    %c0_i32_0 = arith.constant 0 : i32
    %c0_i32_1 = arith.constant 0 : i32
    return %arg1, %c0_i32, %c0_i32_0 : i32, i32, i32
  }
  func.func @transform_14(%arg0: i32, %arg1: i32) -> (i32, i32, i32) {
    %c0_i32 = arith.constant 0 : i32
    %c0_i32_0 = arith.constant 0 : i32
    %c0_i32_1 = arith.constant 0 : i32
    return %arg1, %c0_i32, %c0_i32_0 : i32, i32, i32
  }
  func.func @transform_15(%arg0: i32, %arg1: i32) -> (i32, i32, i32) {
    %c0_i32 = arith.constant 0 : i32
    %c0_i32_0 = arith.constant 0 : i32
    %c0_i32_1 = arith.constant 0 : i32
    return %arg1, %c0_i32, %c0_i32_0 : i32, i32, i32
  }
  func.func @transform_16(%arg0: i32, %arg1: i32) -> (i32, i32, i32) {
    %c0_i32 = arith.constant 0 : i32
    %c0_i32_0 = arith.constant 0 : i32
    %c0_i32_1 = arith.constant 0 : i32
    return %arg1, %c0_i32, %c0_i32_0 : i32, i32, i32
  }
  func.func @transform_17(%arg0: i32, %arg1: i32) -> (i32, i32, i32) {
    %c0_i32 = arith.constant 0 : i32
    %c0_i32_0 = arith.constant 0 : i32
    %c0_i32_1 = arith.constant 0 : i32
    return %arg1, %c0_i32, %c0_i32_0 : i32, i32, i32
  }
  func.func @transform_18(%arg0: i32, %arg1: i32) -> (i32, i32, i32, i32) {
    %c0_i32 = arith.constant 0 : i32
    %c0_i32_0 = arith.constant 0 : i32
    %c0_i32_1 = arith.constant 0 : i32
    %c0_i32_2 = arith.constant 0 : i32
    return %arg1, %c0_i32, %c0_i32_0, %c0_i32_1 : i32, i32, i32, i32
  }
  func.func @transform_19(%arg0: i32, %arg1: i32) -> (i32, i32, i32, i32) {
    %c0_i32 = arith.constant 0 : i32
    %c0_i32_0 = arith.constant 0 : i32
    %c0_i32_1 = arith.constant 0 : i32
    %c0_i32_2 = arith.constant 0 : i32
    return %arg1, %c0_i32, %c0_i32_0, %c0_i32_1 : i32, i32, i32, i32
  }
  func.func @transform_20(%arg0: i32, %arg1: i32) -> (i32, i32, i32) {
    %c0_i32 = arith.constant 0 : i32
    %c0_i32_0 = arith.constant 0 : i32
    %c0_i32_1 = arith.constant 0 : i32
    return %arg0, %c0_i32, %c0_i32_0 : i32, i32, i32
  }
}

</mosaic_0001>

<bundles_post_ra>
// kernel: encoder_forward_device.1
= control target key start
LH: loop header
LB: loop body
LE: loop exit
PB: predicated region body
PF: predicated region fallthrough
CT: control target
= control target key end

     0   :  { %s4345_s0 = inlined_call_operand.vmem [shape: f32[2,8,6], index: 0, kind: input, shape index: {}]   ;;  %s4346_s1 = inlined_call_operand.vmem [shape: f32[8,64], index: 1, kind: input, shape index: {}]   ;;  %s4347_s2 = inlined_call_operand.vmem [shape: f32[6,64], index: 2, kind: input, shape index: {}]   ;;  %s4348_s3 = inlined_call_operand.hbm [shape: f32[1,64], index: 3, kind: input, shape index: {}]   ;;  %s4349_s4 = inlined_call_operand.vmem [shape: f32[2,3,64,64], index: 4, kind: input, shape index: {}]   ;;  %s4350_s5 = inlined_call_operand.vmem [shape: f32[2,3,1,64], index: 5, kind: input, shape index: {}]   ;;  %s4351_s6 = inlined_call_operand.hbm [shape: f32[2,64,64], index: 6, kind: input, shape index: {}]   ;;  %s4352_s7 = inlined_call_operand.vmem [shape: f32[2,1,64], index: 7, kind: input, shape index: {}]   ;;  %s4353_s8 = inlined_call_operand.hbm [shape: f32[2,64,128], index: 8, kind: input, shape index: {}]   ;;  %s4354_s9 = inlined_call_operand.vmem [shape: f32[2,1,128], index: 9, kind: input, shape index: {}]   ;;  %s4355_s10 = inlined_call_operand.vmem [shape: f32[2,128,64], index: 10, kind: input, shape index: {}]   ;;  %s4356_s11 = inlined_call_operand.vmem [shape: f32[2,1,64], index: 11, kind: input, shape index: {}]   ;;  %s4357_s12 = inlined_call_operand.vmem [shape: f32[2,1,64], index: 12, kind: input, shape index: {}]   ;;  %s4358_s13 = inlined_call_operand.vmem [shape: f32[2,1,64], index: 13, kind: input, shape index: {}]   ;;  %s4359_s14 = inlined_call_operand.vmem [shape: f32[2,1,64], index: 14, kind: input, shape index: {}]   ;;  %s4360_s15 = inlined_call_operand.vmem [shape: f32[2,1,64], index: 15, kind: input, shape index: {}]   ;;  %s4361_s16 = inlined_call_operand.vmem [shape: f32[2,1,64], index: 16, kind: input, shape index: {}]   ;;  %s4362_s17 = inlined_call_operand.vmem [shape: f32[2,1,64], index: 17, kind: input, shape index: {}]   ;;  %s4363_s18 = inlined_call_operand.vmem [shape: f32[2,2,1,64], index: 18, kind: input, shape index: {}]   ;;  %s4364_s19 = inlined_call_operand.vmem [shape: f32[2,2,1,64], index: 19, kind: input, shape index: {}]   ;;  %s4365_s20 = inlined_call_operand.hbm [shape: f32[2,8,64], index: 20, kind: output, shape index: {}]  }
   0x1   :  { %4388 = sst [smem:[#allocation29_spill]] %s4345_s0 }
   0x2   :  { %4389 = sst [smem:[#allocation30_spill]] %s4346_s1 }
   0x3   :  { %4390 = sst [smem:[#allocation31_spill]] %s4347_s2 }
   0x4   :  { %4391 = sst [smem:[#allocation32_spill]] %s4348_s3 }
   0x5   :  { %4392 = sst [smem:[#allocation33_spill]] %s4349_s4 }
   0x6   :  { %4393 = sst [smem:[#allocation34_spill]] %s4350_s5 }
   0x7   :  { %4394 = sst [smem:[#allocation35_spill]] %s4351_s6 }
   0x8   :  { %4395 = sst [smem:[#allocation36_spill]] %s4353_s8 }
   0x9   :  { %4396 = sst [smem:[#allocation37_spill]] %s4354_s9 }
   0xa   :  { %4397 = sst [smem:[#allocation38_spill]] %s4355_s10 }
   0xb   :  { %4398 = sst [smem:[#allocation39_spill]] %s4356_s11 }
   0xc   :  { %4399 = sst [smem:[#allocation40_spill]] %s4357_s12 }
   0xd   :  { %4400 = sst [smem:[#allocation41_spill]] %s4358_s13 }
   0xe   :  { %4401 = sst [smem:[#allocation42_spill]] %s4359_s14 }
   0xf   :  { %4402 = sst [smem:[#allocation43_spill]] %s4360_s15 }
  0x10   :  { %4403 = sst [smem:[#allocation44_spill]] %s4361_s16 }
  0x11   :  { %4404 = sst [smem:[#allocation45_spill]] %s4362_s17 }
  0x12   :  { %4405 = sst [smem:[#allocation46_spill]] %s4363_s18 }
  0x13   :  { %4406 = sst [smem:[#allocation47_spill]] %s4364_s19 }
  0x14   :  { %4407 = sst [smem:[#allocation48_spill]] %s4365_s20 }
  0x15   :  { %25 = vsyncpa [#allocation4], 0 }
  0x16   :  { %26 = vsyncpa [#allocation7], 0 }
  0x17   :  { %28 = vsyncpa [#allocation7 + $0x1], 0 }
  0x18   :  { %29 = vsyncpa [#allocation5], 0 }
  0x19   :  { %31 = vsyncpa [#allocation5 + $0x1], 0  ;;  %s3683_s1 = smov 0   ;;  %s3685_s22 = smov 0  }
  0x1a   :  { %s3687_s23 = smov 0   ;;  %s3689_s24 = smov 0  }
  0x1b   :  { %s3691_s2 = smov 0   ;;  %s3693_s25 = smov 0  }
  0x1c   :  { %s3695_s3 = smov 0   ;;  %s3697_s26 = smov 0  }
  0x1d   :  { %s3699_s27 = smov 0   ;;  %s3701_s28 = smov 0  }
  0x1e   :  { %s3703_s4 = smov 0  }
  0x1f LB: > { %4408 = sst [smem:[#allocation13_spill]] %s3524_s1  ;;  %s46_s29 = sadd.s32 1, %s3556_s27  ;;  %s3564_s4 = sphi %s3703_s4, %s37_s4   ;;  %s3560_s28 = sphi %s3701_s28, %s4487_s28   ;;  %s3556_s27 = sphi %s3699_s27, %s4486_s27   ;;  %s3552_s26 = sphi %s3697_s26, %s4485_s26   ;;  %s3548_s3 = sphi %s3695_s3, %s4484_s3   ;;  %s3544_s25 = sphi %s3693_s25, %s4483_s25   ;;  %s3540_s2 = sphi %s3691_s2, %s4482_s2   ;;  %s3536_s24 = sphi %s3689_s24, %s4481_s24   ;;  %s3532_s23 = sphi %s3687_s23, %s4480_s23   ;;  %s3528_s22 = sphi %s3685_s22, %s4479_s22   ;;  %s3524_s1 = sphi %s3683_s1, %s4478_s1  }
  0x20   : > { %4409 = sst [smem:[#allocation14_spill]] %s3528_s22  ;;  %s49_s30 = sadd.s32 1, %s3560_s28 }
  0x21   : > { %4410 = sst [smem:[#allocation15_spill]] %s3532_s23  ;;  %p47_p0 = scmp.ge.s32.totalorder %s46_s29, 2 }
  0x22   : > { %4411 = sst [smem:[#allocation16_spill]] %s3540_s2  ;;  %s197_s0 = sadd.s32 1, %s3544_s25 }
  0x23   : > { %4412 = sst [smem:[#allocation17_spill]] %s3544_s25  ;;  %p204_p1 = scmp.ne.s32.totalorder %s3544_s25, %s3540_s2 }
  0x24   : > { %4413 = sst [smem:[#allocation18_spill]] %s3552_s26  ;;  %p205_p2 = scmp.eq.s32.totalorder %s3564_s4, 0 }
  0x25   : > { %4414 = sst [smem:[#allocation19_spill]] %s3556_s27  ;;  %s4489_s29 = smov (%p47_p0, %s46_s29), 0 }
  0x26   : > { %4415 = sst [smem:[#allocation20_spill]] %s3560_s28  ;;  %s4491_s30 = smov (!%p47_p0, %s49_s30), %s3560_s28 }
  0x27   : > { %4416 = sst [smem:[#allocation21_spill]] %s3564_s4  ;;  %s194_s21 = ssub.s32 %s3556_s27, %s4489_s29 }
  0x28   : > { %4417 = sst [smem:[#allocation22_spill]] %s4489_s29  ;;  %p3749_p3 = por %p205_p2, %p204_p1 }
  0x29   : > { %p51_p4 = scmp.ge.s32.totalorder %s4491_s30, 2  ;;  %p195_p5 = scmp.eq.s32.totalorder %s194_s21, 0 }
  0x2a   : > { %p3238_p6 = scmp.lt.s32.totalorder %s3564_s4, 4  ;;  %s637_s18 = sand.u32 1, %s3564_s4  }
  0x2b   : > { %s4493_s30 = smov (%p51_p4, %s4491_s30), 0  ;;  %s639_s17 = sand.u32 1, %s3544_s25  }
  0x2c   : > { %4419 = sst [smem:[#allocation23_spill]] %s4493_s30  ;;  %s3761_s16 = sshll.u32 %s639_s17, 6 }
  0x2d   : > { %s3757_s19 = scalar_select %p195_p5, %s3544_s25, %s197_s0  }
  0x2e   : > { %s2816_s15 = sshll.u32 %s3556_s27, 10  ;;  %s4421_s6 = sld [smem:[#allocation35_spill]] }
  0x2f   : > { %4420 = sst [smem:[#allocation24_spill]] %s3757_s19  ;;  %s641_s12 = scalar_lea.vmem [#allocation6], %s3761_s16 }
  0x30   : > { %s648_s11 = sshll.u32 %s641_s12, 4  ;;  %p3770_p7 = pnand %p3238_p6, %p3749_p3  ;;  %s649_s11 = int_to_ptr.vmem [resolvable:$true] %s648_s11 }
  0x31   : > { %s3774_s0 = scalar_lea.sflag [#allocation7], %s637_s18  ;;  %s3371_s17 = scalar_lea.vmem %s649_s11, 1024 }
  0x32   : > { %p3360_p8 = pneg %p3770_p7  ;;  %p3372_p9 = scmp.ne.s32.totalorder %s649_s11, %s3371_s17 }
  0x33   : > { %s3566_s14 = smov [#allocation6]  }
  0x34   : > { %s647_s13 = scalar_lea.hbm %s4421_s6, %s2816_s15  ;;  %p3374_p10 = pnand %p3372_p9, %p3360_p8 }
  0x35   : > { %s3376_s12 = sshll.u32 %s3566_s14, 4  ;;  %s3377_s12 = int_to_ptr.vmem [resolvable:$false] %s3376_s12 }
  0x36   : > { %p3375_p11 = pneg %p3374_p10  ;;  %s3378_s20 = scalar_lea.vmem %s3377_s12, 2048 }
  0x37   : > { %p3379_p12 = scmp.lt.s32.totalorder %s649_s11, %s3377_s12  ;;  %p3380_p13 = scmp.lt.s32.totalorder %s3378_s20, %s3371_s17 }
  0x39   : > { %p3381_p0 = por %p3380_p13, %p3379_p12 }
  0x3b   : > { %p3382_p1 = pnand %p3381_p0, %p3375_p11 }
  0x3d   : > { %3385 = shalt.err (!%p3382_p1)
}
  0x3e   : > { %s4370_s29 = smov 128   ;;  %s4371_s18 = smov 8  }
  0x3f   : > { %3229 = dma.hbm_to_vmem [thread:$0]  (!%p3770_p7), %s647_s13, 1024, %s649_s11, %s3774_s0, %s4370_s29, %s4370_s29, %s4371_s18  }
  0x40   : > { %s4423_s8 = sld [smem:[#allocation36_spill]]  ;;  %s668_s20 = scalar_lea.vmem [#allocation8], %s3761_s16 }
  0x41   : > { %s675_s6 = sshll.u32 %s668_s20, 4  ;;  %s3796_s27 = sadd.s32 4294967295, %s3564_s4   ;;  %s3793_s6 = int_to_ptr.vmem [resolvable:$true] %s675_s6 }
  0x42   : > { %s2734_s19 = sadd.s32 4294967294, %s3564_s4   ;;  %p210_p2 = scmp.ne.s32.totalorder %s3540_s2, %s3536_s24 }
  0x43   : > { %p4369_p3 = scmp.eq.s32.totalorder %s3796_s27, 0  ;;  %s558_s11 = ssub.s32 %s3560_s28, %s4493_s30 }
  0x44   : > { %p559_p4 = scmp.eq.s32.totalorder %s558_s11, 0  ;;  %s561_s13 = sadd.s32 1, %s3532_s23 }
  0x45   : > { %p3807_p5 = por %p4369_p3, %p210_p2  ;;  %p571_p6 = scmp.ne.s32.totalorder %s3532_s23, %s3528_s22 }
  0x46   : > { %s3790_s12 = scalar_lea.hbm %s4423_s8, %s2816_s15  ;;  %p572_p9 = scmp.eq.s32.totalorder %s3796_s27, 3 }
  0x47   : > { %s3814_s16 = scalar_select %p559_p4, %s3532_s23, %s561_s13  }
  0x48   : > { %p577_p10 = scmp.ne.s32.totalorder %s3528_s22, %s3524_s1  ;;  %p578_p11 = scmp.eq.s32.totalorder %s2734_s19, 3 }
  0x49   : > { %4425 = sst [smem:[#allocation25_spill]] %s3814_s16  ;;  %p2735_p12 = scmp.ge.s32.totalorder %s3564_s4, 1 }
  0x4a   : > { %p3820_p13 = por %p572_p9, %p571_p6  ;;  %p585_p0 = scmp.lt.s32.totalorder %s3564_s4, 5 }
  0x4b   : > { %p3825_p1 = por %p578_p11, %p577_p10  ;;  %s3569_s20 = smov [#allocation3]  }
  0x4c   : > { %s4426_s24 = scalar_select %p3820_p13, 1, 0 }
  0x4d   : > { %s4428_s17 = scalar_select %p3825_p1, 1, 0 }
  0x4e   : > { %4427 = sst [smem:[#allocation26_spill]] %s4426_s24  ;;  %p3829_p2 = pnand %p2735_p12, %p585_p0 }
  0x4f   : > { %4429 = sst [smem:[#allocation27_spill]] %s4428_s17  ;;  %s604_s11 = sshll.u32 %s3569_s20, 4  ;;  %s605_s11 = int_to_ptr.vmem [resolvable:$true] %s604_s11 }
  0x50   : > { %p3222_p4 = pneg %p3829_p2  ;;  %s3399_s19 = scalar_lea.vmem %s3793_s6, 1024 }
  0x51   : > { %p3400_p3 = scmp.ne.s32.totalorder %s3793_s6, %s3399_s19  ;;  %s3570_s13 = smov [#allocation8]  }
  0x52   : > { %s3404_s29 = sshll.u32 %s3570_s13, 4  ;;  %s3405_s29 = int_to_ptr.vmem [resolvable:$false] %s3404_s29 }
  0x53   : > { %p3402_p6 = pnand %p3400_p3, %p3360_p8  ;;  %s3406_s18 = scalar_lea.vmem %s3405_s29, 2048 }
  0x54   : > { %p3407_p10 = scmp.lt.s32.totalorder %s3793_s6, %s3405_s29  ;;  %p3408_p11 = scmp.lt.s32.totalorder %s3406_s18, %s3399_s19 }
  0x55   : > { %p3403_p9 = pneg %p3402_p6 }
  0x56   : > { %p3409_p12 = por %p3408_p11, %p3407_p10 }
  0x58   : > { %p3410_p0 = pnand %p3409_p12, %p3403_p9 }
  0x5a   : > { %3413 = shalt.err (!%p3410_p0)
}
  0x5b   : > { %s4431_s20 = smov 8   ;;  %s4432_s8 = smov 128  }
  0x5c   : > { %3232 = dma.hbm_to_vmem [thread:$0]  (!%p3770_p7), %s3790_s12, 1024, %s3793_s6, %s3774_s0, %s4432_s8, %s4432_s8, %s4431_s20  }
  0x5d   : > { %p4433_p8 = scmp.eq.s32.totalorder %s3796_s27, 0  ;;  %s3425_s29 = scalar_lea.vmem %s605_s11, 16 }
  0x5e   : > { %p3426_p9 = scmp.ne.s32.totalorder %s605_s11, %s3425_s29  ;;  %s3432_s21 = scalar_lea.vmem %s605_s11, 32 }
  0x5f   : > { %p3223_p3 = pnand %p3222_p4, %p4433_p8  ;;  %p3433_p12 = scmp.lt.s32.totalorder %s605_s11, %s605_s11 }
  0x60   : > { %p3434_p0 = scmp.lt.s32.totalorder %s3432_s21, %s3425_s29 }
  0x61   : > { %p3416_p6 = pneg %p3223_p3 }
  0x62   : > { %p3435_p1 = por %p3434_p0, %p3433_p12 }
  0x63   : > { %p3428_p10 = pnand %p3426_p9, %p3416_p6 }
  0x65   : > { %p3429_p11 = pneg %p3428_p10 }
  0x67   : > { %p3436_p13 = pnand %p3435_p1, %p3429_p11 }
  0x69   : > { %3439 = shalt.err (!%p3436_p13)
}
  0x6a   : > { %s4434_s13 = sld [smem:[#allocation32_spill]] }
  0x6c   : > { %757 = sbr.rel (%p3829_p2) target bundleno = 4118 (0x1016), region = 100 }
  0x70   : > { %3225 = dma.hbm_to_vmem [thread:$0]  (!%p3223_p3), %s4434_s13, 16, %s605_s11, [#allocation4]  }
  0x71   : > { %p4435_p7 = scmp.eq.s32.totalorder %s3796_s27, 0 }
  0x73   : > { %3511 = dma.done.wait (%p4435_p7), [#allocation4], 16   ;;  %p4436_p4 = pmov %p4435_p7 }
  0x74   : > { %s763_s6 = sand.u32 1, %s3796_s27   ;;  %s765_s8 = sand.u32 1, %s3540_s2  }
  0x75   : > { %3513 = vsyncadd (%p4436_p4), [#allocation4], 4294967280  ;;  %s3865_s0 = sshll.u32 %s765_s8, 6  ;;  %s764_s12 = scalar_lea.sflag [#allocation7], %s763_s6 }
  0x76   : > { %s3868_s20 = scalar_lea.vmem [#allocation6], %s3865_s0 }
  0x77   : > { %3515 = dma.done.wait (%p3807_p5), %s764_s12, 2048  }
  0x78   : > { %3517 = vsyncadd (%p3807_p5), %s764_s12, 4294965248  ;;  %s4373_s14 = sand.u32 1, %s3528_s22   ;;  %p891_p13 = scmp.lt.s32.totalorder %s3552_s26, 1 }
  0x79   : > { %s3877_s27 = sshll.u32 %s4373_s14, 3  ;;  %p895_p1 = scmp.lt.s32.totalorder %s3548_s3, 1 }
  0x7a   : > { %s892_s11 = scalar_select %p891_p13, %s3552_s26, 1 }
  0x7b   : > { %s3883_s29 = scalar_select %p895_p1, %s3548_s3, 1 }
  0x7c   : > { %s2749_s15 = sshll.u32 %s892_s11, 3  ;;  %s4437_s19 = sld [smem:[#allocation29_spill]] }
  0x7d   : > { %s3210_s6 = smul.u32 192, %s3883_s29  ;;  %s4438_s2 = sld [smem:[#allocation33_spill]] }
  0x7e   : > { %s3211_s8 = smul.u32 3, %s3883_s29  ;;  %s4440_s5 = sld [smem:[#allocation34_spill]] }
  0x7f   : > { %s2818_s17 = sshll.u32 %s3883_s29, 7  ;;  %s4441_s10 = sld [smem:[#allocation38_spill]] }
  0x80   : > { %s4445_s22 = sld [smem:[#allocation41_spill]]  ;;  %s2753_s23 = sshll.u32 %s3883_s29, 1 }
  0x81   : > { %s4448_s25 = sld [smem:[#allocation44_spill]]  ;;  %s3954_s9 = scalar_lea.vmem [#allocation8], %s3865_s0 }
  0x82   : > { %s894_s13 = scalar_lea.vmem %s4437_s19, %s2749_s15  ;;  %s4449_s4 = sld [smem:[#allocation45_spill]] }
  0x83   : > { %s3897_s16 = scalar_lea.vmem %s4438_s2, %s3210_s6  ;;  %s4451_s15 = sld [smem:[#allocation47_spill]] }
  0x84   : > { %s3906_s19 = scalar_lea.vmem %s4440_s5, %s3211_s8  ;;  %s890_s1 = scalar_lea.vmem [#allocation9], %s3877_s27 }
  0x85   : > { %s3912_s12 = scalar_lea.vmem %s4441_s10, %s2818_s17  ;;  %s4447_s17 = sld [smem:[#allocation43_spill]] }
  0x86   : > { %4442 = sst [smem:[#allocation28_spill]] %s3912_s12  ;;  %s923_s18 = scalar_lea.vmem %s4445_s22, %s3883_s29 }
  0x87   : > { %s932_s28 = scalar_lea.vmem %s4448_s25, %s3883_s29  ;;  %s4450_s22 = sld [smem:[#allocation46_spill]] }
  0x88   : > { %s935_s30 = scalar_lea.vmem %s4449_s4, %s3883_s29  ;;  %p2755_p5 = scmp.ne.s32.totalorder %s3548_s3, 0 }
  0x89   : > { %s3951_s26 = scalar_lea.vmem %s4451_s15, %s2753_s23  ;;  %s4452_s6 = sld [smem:[#allocation31_spill]] (!%p2755_p5) }
  0x8a   : > { %947 = sbr.rel (%p2755_p5) target bundleno = 344 (0x158), region = 116 }
  0x8b   : > { %s929_s14 = scalar_lea.vmem %s4447_s17, %s3883_s29  ;;  %s4453_s17 = sld [smem:[#allocation30_spill]] (!%p2755_p5) }
  0x8d   : > { %s3946_s21 = scalar_lea.vmem %s4450_s22, %s2753_s23 }
  0x8f   : > { %v949_v0 = vld [vmem:[%s4452_s6] sm:$0x3f]  ;;  %vm961_vm0 = vcmask 1045504   ;;  %v3571_v2 = vmov 0.0   ;;  %vm3572_vm1 = vmmov 0   ;;  %vm957_vm2 = vcmask 48128  }
  0x90   : > { %v948_v1 = vld [vmem:[%s894_s13] sm:$0xff]  ;;  %2946 = vmatprep.subr.mxu0 %v3571_v2  ;;  %2948 = vmatprep.mubr.msk.f32.mxu0 %vm3572_vm1, %v3571_v2  ;;  %v2756_v3 = vld [vmem:[#allocation3] ss:$0 sm:$0xff]  ;;  %vm1037_vm3 = vcmask 523264  }
  0x91   : > { %2947 = vmatpush3.msk.msra.mxu0 %vm961_vm0, %v949_v0  ;;  %v1035_v5 = vld [vmem:[%s4453_s17] sm:$0xff] }
  0x92   : > { %2949 = vmatmul.mubr.msk.f32.vlgmr.msra.gmra.mxu0 %vm957_vm2, %v948_v1 }
 0x152   : > { %v1031_v4 = vpop.f32.mrf.mxu0 }
 0x153   : > { %v1032_v6 = vadd.f32 %v2756_v3, %v1031_v4 }
 0x154   : > { %v2950_v7 = vpop.f32.mrf.mxu0 }
 0x155   : > { %v1036_v8 = vadd.f32 %v1035_v5, %v1032_v6 }
 0x157   : > { %1038 = vst.msk [vmem:[#allocation2] sm:$0xff] %vm1037_vm3, %v1036_v8 }
 0x158 PF: > { %v1047_v9 = vld [vmem:[%s3897_s16 + $0x38] sm:$0xff]  ;;  %v3573_v11 = vmov 0.0   ;;  %v1046_v12 = vld [vmem:[%s3897_s16 + $0x30] sm:$0xff]  ;;  %v1045_v14 = vld [vmem:[%s3897_s16 + $0x28] sm:$0xff]  ;;  %vm1055_vm4 = vcmask 523264   ;;  %vm3574_vm5 = vmmov 0  }
 0x159   : > { %v2768_v10 = vld [vmem:[%s3897_s16 + $0x78] sm:$0xff]  ;;  %2951 = vmatprep.subr.mxu0 %v3573_v11  ;;  %2970 = vmatprep.subr.mxu1 %v3573_v11  ;;  %v2767_v13 = vld [vmem:[%s3897_s16 + $0x70] sm:$0xff]  ;;  %v2766_v15 = vld [vmem:[%s3897_s16 + $0x68] sm:$0xff]  ;;  %vm1405_vm6 = vcmask 64512   ;;  %v3575_v43 = vmov 1.0   ;;  %v3576_v60 = vmov 0  }
 0x15a   : > { %2952 = vmatpush3.msra.mxu0 %v1047_v9  ;;  %2971 = vmatpush3.msra.mxu1 %v2768_v10  ;;  %v1044_v16 = vld [vmem:[%s3897_s16 + $0x20] sm:$0xff]  ;;  %v1043_v18 = vld [vmem:[%s3897_s16 + $0x18] sm:$0xff]  ;;  %v1042_v20 = vld [vmem:[%s3897_s16 + $0x10] sm:$0xff]  ;;  %s4455_s25 = sld [smem:[#allocation40_spill]]  ;;  %p2811_p2 = scmp.ne.s32.totalorder %s3548_s3, 1 }
 0x15b   : > { %2953 = vmatprep.subr.mxu0 %v3573_v11  ;;  %2972 = vmatprep.subr.mxu1 %v3573_v11  ;;  %v2765_v17 = vld [vmem:[%s3897_s16 + $0x60] sm:$0xff]  ;;  %v2764_v19 = vld [vmem:[%s3897_s16 + $0x58] sm:$0xff]  ;;  %v2763_v21 = vld [vmem:[%s3897_s16 + $0x50] sm:$0xff]  ;;  %s4458_s22 = sld [smem:[#allocation28_spill]] }
 0x15c   : > { %2954 = vmatpush3.msra.mxu0 %v1046_v12  ;;  %2973 = vmatpush3.msra.mxu1 %v2767_v13  ;;  %v1041_v22 = vld [vmem:[%s3897_s16 + $0x8] sm:$0xff]  ;;  %v1040_v24 = vld [vmem:[%s3897_s16] sm:$0xff]  ;;  %v2779_v44 = vld [vmem:[%s3897_s16 + $0xb8] sm:$0xff]  ;;  %s4459_s8 = sld [smem:[#allocation37_spill]] }
 0x15d   : > { %2955 = vmatprep.subr.mxu0 %v3573_v11  ;;  %2974 = vmatprep.subr.mxu1 %v3573_v11  ;;  %v2762_v23 = vld [vmem:[%s3897_s16 + $0x48] sm:$0xff]  ;;  %v2761_v25 = vld [vmem:[%s3897_s16 + $0x40] sm:$0xff]  ;;  %v2778_v45 = vld [vmem:[%s3897_s16 + $0xb0] sm:$0xff]  ;;  %s4461_s10 = sld [smem:[#allocation39_spill]] }
 0x15e   : > { %2956 = vmatpush3.msra.mxu0 %v1045_v14  ;;  %2975 = vmatpush3.msra.mxu1 %v2766_v15  ;;  %v3996_v26 = vld [vmem:[#allocation2] sm:$0xff]  ;;  %v2777_v46 = vld [vmem:[%s3897_s16 + $0xa8] sm:$0xff]  ;;  %v2775_v48 = vld [vmem:[%s3897_s16 + $0x98] sm:$0xff]  ;;  %s4463_s11 = sld [smem:[#allocation42_spill]] }
 0x15f   : > { %2957 = vmatprep.subr.mxu0 %v3573_v11  ;;  %2976 = vmatprep.subr.mxu1 %v3573_v11  ;;  %v2759_v27 = vld [vmem:[%s3906_s19] ss:$0 sm:$0xff]  ;;  %v2770_v28 = vld [vmem:[%s3906_s19 + $0x1] ss:$0 sm:$0xff]  ;;  %v2774_v49 = vld [vmem:[%s3897_s16 + $0x90] sm:$0xff] }
 0x160   : > { %2958 = vmatpush3.msra.mxu0 %v1044_v16  ;;  %2977 = vmatpush3.msra.mxu1 %v2765_v17  ;;  %v2783_v30 = vld [vmem:[%s3946_s21] ss:$0 sm:$0xff]  ;;  %v2784_v31 = vld [vmem:[%s3946_s21 + $0x1] ss:$0 sm:$0xff]  ;;  %v2773_v50 = vld [vmem:[%s3897_s16 + $0x88] sm:$0xff]  ;;  %s4456_s2 = scalar_lea.vmem %s4455_s25, %s3883_s29 }
 0x161   : > { %2959 = vmatprep.subr.mxu0 %v3573_v11  ;;  %2978 = vmatprep.subr.mxu1 %v3573_v11  ;;  %v2776_v47 = vld [vmem:[%s3897_s16 + $0xa0] sm:$0xff]  ;;  %v1616_v12 = vld [vmem:[%s3868_s20 + $0x28] sm:$0xff]  ;;  %v1615_v13 = vld [vmem:[%s3868_s20 + $0x20] sm:$0xff] }
 0x162   : > { %2960 = vmatpush3.msra.mxu0 %v1043_v18  ;;  %2979 = vmatpush3.msra.mxu1 %v2764_v19  ;;  %v2772_v51 = vld [vmem:[%s3897_s16 + $0x80] sm:$0xff]  ;;  %v1612_v16 = vld [vmem:[%s3868_s20 + $0x8] sm:$0xff]  ;;  %v1611_v17 = vld [vmem:[%s3868_s20] sm:$0xff]  ;;  %s4460_s5 = scalar_lea.vmem %s4459_s8, %s3883_s29 }
 0x163   : > { %2961 = vmatprep.subr.mxu0 %v3573_v11  ;;  %2980 = vmatprep.subr.mxu1 %v3573_v11  ;;  %v2781_v61 = vld [vmem:[%s3906_s19 + $0x2] ss:$0 sm:$0xff]  ;;  %v1617_v10 = vld [vmem:[%s3868_s20 + $0x30] sm:$0xff]  ;;  %s4462_s12 = scalar_lea.vmem %s4461_s10, %s3883_s29 }
 0x164   : > { %2962 = vmatpush3.msra.mxu0 %v1042_v20  ;;  %2981 = vmatpush3.msra.mxu1 %v2763_v21  ;;  %v1618_v9 = vld [vmem:[%s3868_s20 + $0x38] sm:$0xff]  ;;  %v1613_v15 = vld [vmem:[%s3868_s20 + $0x10] sm:$0xff]  ;;  %s4464_s17 = scalar_lea.vmem %s4463_s11, %s3883_s29 }
 0x165   : > { %2963 = vmatprep.subr.mxu0 %v3573_v11  ;;  %2982 = vmatprep.subr.mxu1 %v3573_v11  ;;  %v1614_v14 = vld [vmem:[%s3868_s20 + $0x18] sm:$0xff]  ;;  %v2793_v18 = vld [vmem:[%s3951_s26 + $0x1] ss:$0 sm:$0xff]  ;;  %v2792_v20 = vld [vmem:[%s3951_s26] ss:$0 sm:$0xff]  ;;  %s4454_s20 = scalar_lea.vmem %s4352_s7, %s3883_s29 }
 0x166   : > { %2964 = vmatpush3.msra.mxu0 %v1041_v22  ;;  %2983 = vmatpush3.msra.mxu1 %v2762_v23 }
 0x167   : > { %2965 = vmatprep.subr.mxu0 %v3573_v11  ;;  %2984 = vmatprep.subr.mxu1 %v3573_v11 }
 0x168   : > { %2966 = vmatpush3.msra.mxu0 %v1040_v24  ;;  %2967 = vmatprep.mubr.msk.f32.mxu0 %vm3574_vm5, %v3573_v11 }
 0x169   : > { %2985 = vmatpush3.msra.mxu1 %v2761_v25  ;;  %2986 = vmatprep.mubr.msk.f32.mxu1 %vm3574_vm5, %v3573_v11  ;;  %v2794_v25 = vld [vmem:[%s4454_s20] ss:$0 sm:$0xff] }
 0x16a   : > { %2968 = vmatmul.mubr.msk.f32.vlgmr.msra.gmra.mxu0 %vm1055_vm4, %v3996_v26  ;;  %2987 = vmatmul.mubr.msk.f32.vlgmr.msra.gmra.mxu1 %vm1055_vm4, %v3996_v26 }
 0x16b   : > { %2989 = vmatprep.subr.mxu0 %v3573_v11  ;;  %3005 = vmatprep.mubr.msk.f32.mxu0 %vm3574_vm5, %v3573_v11 }
 0x16c   : > { %2990 = vmatpush3.msra.mxu0 %v2779_v44  ;;  %3338 = vset.pattern.permute.xlu1 %v3576_v60 }
 0x16d   : > { %2991 = vmatprep.subr.mxu0 %v3573_v11  ;;  %3339 = vset.pattern.permute.xlu0 %v3576_v60  ;;  %v2005_v60 = vld [vmem:[%s4458_s22 + $0x58] sm:$0xff] }
 0x16e   : > { %2992 = vmatpush3.msra.mxu0 %v2778_v45 }
 0x16f   : > { %2993 = vmatprep.subr.mxu0 %v3573_v11 }
 0x170   : > { %2994 = vmatpush3.msra.mxu0 %v2777_v46  ;;  %v1881_v46 = vld [vmem:[%s3954_s9 + $0x10] sm:$0xff] }
 0x171   : > { %2995 = vmatprep.subr.mxu0 %v3573_v11 }
 0x172   : > { %2996 = vmatpush3.msra.mxu0 %v2776_v47  ;;  %v1880_v47 = vld [vmem:[%s3954_s9 + $0x8] sm:$0xff] }
 0x173   : > { %2997 = vmatprep.subr.mxu0 %v3573_v11 }
 0x174   : > { %2998 = vmatpush3.msra.mxu0 %v2775_v48 }
 0x175   : > { %2999 = vmatprep.subr.mxu0 %v3573_v11 }
 0x176   : > { %3000 = vmatpush3.msra.mxu0 %v2774_v49  ;;  %v1879_v49 = vld [vmem:[%s3954_s9] sm:$0xff] }
 0x177   : > { %3001 = vmatprep.subr.mxu0 %v3573_v11 }
 0x178   : > { %3002 = vmatpush3.msra.mxu0 %v2773_v50  ;;  %v2798_v50 = vld [vmem:[%s4456_s2] ss:$0 sm:$0xff] }
 0x179   : > { %3003 = vmatprep.subr.mxu0 %v3573_v11 }
 0x17a   : > { %3004 = vmatpush3.msra.mxu0 %v2772_v51 }
 0x17b   : > { %3006 = vmatmul.mubr.msk.f32.vlgmr.msra.gmra.mxu0 %vm1055_vm4, %v3996_v26  ;;  %3042 = vmatprep.subr.mxu0 %v3573_v11 }
 0x17c   : > { %3043 = vmatpush3.msra.mxu0 %v3575_v43  ;;  %3058 = vmatprep.mubr.msk.f32.mxu0 %vm3574_vm5, %v3573_v11 }
 0x17d   : > { %3044 = vmatprep.subr.mxu0 %v3573_v11 }
 0x17e   : > { %3045 = vmatpush3.msra.mxu0 %v3575_v43 }
 0x17f   : > { %3046 = vmatprep.subr.mxu0 %v3573_v11 }
 0x180   : > { %3047 = vmatpush3.msra.mxu0 %v3575_v43 }
 0x181   : > { %3048 = vmatprep.subr.mxu0 %v3573_v11 }
 0x182   : > { %3049 = vmatpush3.msra.mxu0 %v3575_v43 }
 0x183   : > { %3050 = vmatprep.subr.mxu0 %v3573_v11 }
 0x184   : > { %3051 = vmatpush3.msra.mxu0 %v3575_v43 }
 0x185   : > { %3052 = vmatprep.subr.mxu0 %v3573_v11 }
 0x186   : > { %3053 = vmatpush3.msra.mxu0 %v3575_v43 }
 0x187   : > { %3054 = vmatprep.subr.mxu0 %v3573_v11 }
 0x188   : > { %3055 = vmatpush3.msra.mxu0 %v3575_v43 }
 0x189   : > { %3056 = vmatprep.subr.mxu0 %v3573_v11 }
 0x18a   : > { %3057 = vmatpush3.msra.mxu0 %v3575_v43 }
 0x18b   : > { %3080 = vmatprep.subr.mxu0 %v3573_v11 }
 0x22a   : > { %v1125_v29 = vpop.f32.mrf.mxu0  ;;  %v1212_v32 = vpop.f32.mrf.mxu1 }
 0x22b   : > { %v1126_v33 = vadd.f32 %v2759_v27, %v1125_v29  ;;  %v1213_v34 = vadd.f32 %v2770_v28, %v1212_v32 }
 0x22c   : > { %v2969_v35 = vpop.f32.mrf.mxu0  ;;  %v2988_v36 = vpop.f32.mrf.mxu1 }
 0x22d   : > { %v1313_v37 = vmul.f32 %v2783_v30, %v1126_v33  ;;  %v1320_v38 = vmul.f32 %v2784_v31, %v1126_v33  ;;  %3008 = vmatprep.subr.msk.mxu1 %vm1055_vm4, %v1213_v34 }
 0x22e   : > { %3009 = vmatpush3.xpose.msk.msra.mxu1 %vm1055_vm4, %v1213_v34 }
 0x22f   : > { %3010 = vmatprep.mubr.msk.f32.mxu1 %vm1055_vm4, %v1313_v37  ;;  %3013 = vmatprep.subr.mxu1 %v3575_v43  ;;  %v1885_v37 = vld [vmem:[%s3954_s9 + $0x30] sm:$0xff] }
 0x231   : > { %3011 = vmatmul.mubr.msk.f32.vlgmr.msra.gmra.mxu1 %vm1055_vm4, %v1320_v38  ;;  %v1884_v38 = vld [vmem:[%s3954_s9 + $0x28] sm:$0xff] }
 0x232   : > { %3014 = vmatpush3.msra.mxu1 %v3575_v43 }
 0x23b   : > { %v1299_v62 = vpop.f32.mrf.mxu0 }
 0x23c   : > { %v1300_v63 = vadd.f32 %v2781_v61, %v1299_v62  ;;  %v2004_v61 = vld [vmem:[%s4458_s22 + $0x50] sm:$0xff]  ;;  %v2003_v62 = vld [vmem:[%s4458_s22 + $0x48] sm:$0xff] }
 0x23d   : > { %v3007_v0 = vpop.f32.mrf.mxu0 }
 0x23e   : > { %3018 = vmatprep.subr.mxu1 %v1300_v63  ;;  %v2001_v0 = vld [vmem:[%s4458_s22 + $0x38] sm:$0xff] }
 0x2f1   : > { %v3012_v39 = vpop.f32.mrf.mxu1 }
 0x2f2   : > { %v1409_v42 = vsel %vm1405_vm6, %v3012_v39, -inf }
 0x2f3   : > { %v1396_v40 = vpop.f32.mrf.mxu1 }
 0x2f4   : > { %v1406_v41 = vsel %vm1405_vm6, %v1396_v40, -inf }
 0x2f5   : > { %1407 = vmax.xlane.f32.xlu0 %v1406_v41 }
 0x2f9   : > { %1410 = vmax.xlane.f32.xlu0 %v1409_v42 }
 0x37e   : > { %v1408_v52 = vpop.xlane.xlu0 %1407 }
 0x37f   : > { %v1412_v53 = vsub.f32 %v1396_v40, %v1408_v52  ;;  %v1882_v40 = vld [vmem:[%s3954_s9 + $0x18] sm:$0xff] }
 0x381   : > { %v1414_v54 = vmul.f32 1.442695, %v1412_v53  ;;  %v2799_v53 = vld [vmem:[%s923_s18] ss:$0 sm:$0xff] }
 0x382   : > { %v1411_v55 = vpop.xlane.xlu0 %1410 }
 0x383   : > { %3340 = vpow2.f32 %v1414_v54  ;;  %v1413_v56 = vsub.f32 %v3012_v39, %v1411_v55  ;;  %v1883_v39 = vld [vmem:[%s3954_s9 + $0x20] sm:$0xff] }
 0x385   : > { %v1416_v57 = vmul.f32 1.442695, %v1413_v56  ;;  %v2009_v56 = vld [vmem:[%s4458_s22 + $0x78] sm:$0xff] }
 0x387   : > { %3342 = vpow2.f32 %v1416_v57  ;;  %v2008_v57 = vld [vmem:[%s4458_s22 + $0x70] sm:$0xff] }
 0x390   : > { %v3341_v58 = vpop.eup %3340 }
 0x391   : > { %3015 = vmatprep.mubr.msk.f32.mxu1 %vm1405_vm6, %v3341_v58 }
 0x394   : > { %v3343_v59 = vpop.eup %3342 }
 0x395   : > { %3016 = vmatmul.mubr.msk.f32.vlgmr.msra.gmra.mxu1 %vm1405_vm6, %v3343_v59 }
 0x396   : > { %3019 = vmatpush3.msra.mxu1 %v1300_v63  ;;  %v2002_v63 = vld [vmem:[%s4458_s22 + $0x40] sm:$0xff] }
 0x397   : > { %3023 = vmatprep.subr.mxu1 %v3573_v11 }
 0x455   : > { %v3017_v1 = vpop.f32.mrf.mxu1 }
 0x457   : > { %v1490_v2 = vpop.f32.mrf.mxu1 }
 0x458   : > { %3344 = vrcp.f32 %v1490_v2  ;;  %v1999_v2 = vld [vmem:[%s4458_s22 + $0x28] sm:$0xff] }
 0x459   : > { %3346 = vrcp.f32 %v3017_v1  ;;  %v2000_v1 = vld [vmem:[%s4458_s22 + $0x30] sm:$0xff] }
 0x465   : > { %v3345_v3 = vpop.eup %3344 }
 0x466   : > { %1505 = vperm.xlu1 %3338, %v3345_v3   ;;  %v3347_v4 = vpop.eup %3346  ;;  %v1998_v3 = vld [vmem:[%s4458_s22 + $0x20] sm:$0xff] }
 0x46a   : > { %1510 = vperm.xlu1 %3338, %v3347_v4   ;;  %v1997_v4 = vld [vmem:[%s4458_s22 + $0x18] sm:$0xff] }
 0x4e1   : > { %v1506_v5 = vpop.permute.xlu1 %1505 }
 0x4e2   : > { %v1513_v6 = vmul.f32 %v3341_v58, %v1506_v5  ;;  %v2007_v58 = vld [vmem:[%s4458_s22 + $0x68] sm:$0xff]  ;;  %v1996_v5 = vld [vmem:[%s4458_s22 + $0x10] sm:$0xff] }
 0x4e4   : > { %3020 = vmatprep.mubr.msk.f32.mxu1 %vm1405_vm6, %v1513_v6  ;;  %v1995_v6 = vld [vmem:[%s4458_s22 + $0x8] sm:$0xff] }
 0x4e5   : > { %v1511_v7 = vpop.permute.xlu1 %1510 }
 0x4e6   : > { %v1514_v8 = vmul.f32 %v3343_v59, %v1511_v7  ;;  %v2006_v59 = vld [vmem:[%s4458_s22 + $0x60] sm:$0xff] }
 0x4e7   : > { %v1994_v7 = vld [vmem:[%s4458_s22] sm:$0xff] }
 0x4e8   : > { %3021 = vmatmul.mubr.msk.f32.vlgmr.msra.gmra.mxu1 %vm1405_vm6, %v1514_v8  ;;  %v2800_v8 = vld [vmem:[%s4460_s5] ss:$0 sm:$0xff] }
 0x4e9   : > { %3024 = vmatpush3.msra.mxu1 %v1618_v9  ;;  %3039 = vmatprep.mubr.msk.f32.mxu1 %vm3574_vm5, %v3573_v11 }
 0x4ea   : > { %3025 = vmatprep.subr.mxu1 %v3573_v11 }
 0x4eb   : > { %3026 = vmatpush3.msra.mxu1 %v1617_v10 }
 0x4ec   : > { %3027 = vmatprep.subr.mxu1 %v3573_v11 }
 0x4ed   : > { %3028 = vmatpush3.msra.mxu1 %v1616_v12 }
 0x4ee   : > { %3029 = vmatprep.subr.mxu1 %v3573_v11 }
 0x4ef   : > { %3030 = vmatpush3.msra.mxu1 %v1615_v13 }
 0x4f0   : > { %3031 = vmatprep.subr.mxu1 %v3573_v11 }
 0x4f1   : > { %3032 = vmatpush3.msra.mxu1 %v1614_v14 }
 0x4f2   : > { %3033 = vmatprep.subr.mxu1 %v3573_v11 }
 0x4f3   : > { %3034 = vmatpush3.msra.mxu1 %v1613_v15 }
 0x4f4   : > { %3035 = vmatprep.subr.mxu1 %v3573_v11 }
 0x4f5   : > { %3036 = vmatpush3.msra.mxu1 %v1612_v16 }
 0x4f6   : > { %3037 = vmatprep.subr.mxu1 %v3573_v11 }
 0x4f7   : > { %3038 = vmatpush3.msra.mxu1 %v1611_v17 }
 0x4f8   : > { %3061 = vmatprep.subr.mxu1 %v3573_v11 }
 0x5a8   : > { %v3022_v19 = vpop.f32.mrf.mxu1 }
 0x5a9   : > { %v1609_v22 = vmul.f32 %v3022_v19, %v2793_v18 }
 0x5aa   : > { %v1587_v21 = vpop.f32.mrf.mxu1 }
 0x5ab   : > { %v1602_v23 = vmul.f32 %v2792_v20, %v1587_v21 }
 0x5ad   : > { %v1610_v24 = vadd.f32 %v1609_v22, %v1602_v23 }
 0x5af   : > { %3040 = vmatmul.mubr.msk.f32.vlgmr.msra.gmra.mxu1 %vm1055_vm4, %v1610_v24 }
 0x5b0   : > { %3062 = vmatpush3.msra.mxu1 %v3575_v43  ;;  %3077 = vmatprep.mubr.msk.f32.mxu1 %vm3574_vm5, %v3573_v11 }
 0x5b1   : > { %3063 = vmatprep.subr.mxu1 %v3573_v11 }
 0x5b2   : > { %3064 = vmatpush3.msra.mxu1 %v3575_v43 }
 0x5b3   : > { %3065 = vmatprep.subr.mxu1 %v3573_v11 }
 0x5b4   : > { %3066 = vmatpush3.msra.mxu1 %v3575_v43 }
 0x5b5   : > { %3067 = vmatprep.subr.mxu1 %v3573_v11 }
 0x5b6   : > { %3068 = vmatpush3.msra.mxu1 %v3575_v43 }
 0x5b7   : > { %3069 = vmatprep.subr.mxu1 %v3573_v11 }
 0x5b8   : > { %3070 = vmatpush3.msra.mxu1 %v3575_v43 }
 0x5b9   : > { %3071 = vmatprep.subr.mxu1 %v3573_v11 }
 0x5ba   : > { %3072 = vmatpush3.msra.mxu1 %v3575_v43 }
 0x5bb   : > { %3073 = vmatprep.subr.mxu1 %v3573_v11 }
 0x5bc   : > { %3074 = vmatpush3.msra.mxu1 %v3575_v43 }
 0x5bd   : > { %3075 = vmatprep.subr.mxu1 %v3573_v11 }
 0x5be   : > { %3076 = vmatpush3.msra.mxu1 %v3575_v43 }
 0x5bf   : > { %3099 = vmatprep.subr.mxu1 %v3573_v11 }
 0x66f   : > { %v1695_v27 = vpop.f32.mrf.mxu1 }
 0x670   : > { %v1696_v28 = vadd.f32 %v2794_v25, %v1695_v27 }
 0x671   : > { %v3041_v29 = vpop.f32.mrf.mxu1 }
 0x672   : > { %v1699_v30 = vadd.f32 %v1696_v28, %v3996_v26  ;;  %v1886_v26 = vld [vmem:[%s3954_s9 + $0x38] sm:$0xff] }
 0x674   : > { %3059 = vmatmul.mubr.msk.f32.vlgmr.msra.gmra.mxu0 %vm1055_vm4, %v1699_v30 }
 0x675   : > { %3096 = vmatprep.mubr.msk.f32.mxu0 %vm3574_vm5, %v3573_v11  ;;  %3081 = vmatpush3.msra.mxu0 %v1886_v26 }
 0x676   : > { %3082 = vmatprep.subr.mxu0 %v3573_v11 }
 0x677   : > { %3083 = vmatpush3.msra.mxu0 %v1885_v37 }
 0x678   : > { %3084 = vmatprep.subr.mxu0 %v3573_v11 }
 0x679   : > { %3085 = vmatpush3.msra.mxu0 %v1884_v38  ;;  %v2802_v38 = vld [vmem:[%s4462_s12] ss:$0 sm:$0xff] }
 0x67a   : > { %3086 = vmatprep.subr.mxu0 %v3573_v11 }
 0x67b   : > { %3087 = vmatpush3.msra.mxu0 %v1883_v39 }
 0x67c   : > { %3088 = vmatprep.subr.mxu0 %v3573_v11 }
 0x67d   : > { %3089 = vmatpush3.msra.mxu0 %v1882_v40 }
 0x67e   : > { %3090 = vmatprep.subr.mxu0 %v3573_v11 }
 0x67f   : > { %3091 = vmatpush3.msra.mxu0 %v1881_v46 }
 0x680   : > { %3092 = vmatprep.subr.mxu0 %v3573_v11 }
 0x681   : > { %3093 = vmatpush3.msra.mxu0 %v1880_v47 }
 0x682   : > { %3094 = vmatprep.subr.mxu0 %v3573_v11 }
 0x683   : > { %3095 = vmatpush3.msra.mxu0 %v1879_v49 }
 0x684   : > { %3134 = vmatprep.subr.mxu0 %v3573_v11 }
 0x734   : > { %v1771_v31 = vpop.f32.mrf.mxu0 }
 0x735   : > { %v1775_v32 = vmul.f32 0.015625, %v1771_v31 }
 0x736   : > { %v3060_v33 = vpop.f32.mrf.mxu0 }
 0x737   : > { %1778 = vperm.xlu0 %3339, %v1775_v32  }
 0x7b2   : > { %v1779_v34 = vpop.permute.xlu0 %1778 }
 0x7b3   : > { %v1781_v35 = vsub.f32 %v1699_v30, %v1779_v34 }
 0x7b5   : > { %v1782_v36 = vmul.f32 %v1781_v35, %v1781_v35 }
 0x7b7   : > { %3078 = vmatmul.mubr.msk.f32.vlgmr.msra.gmra.mxu1 %vm1055_vm4, %v1782_v36 }
 0x7b8   : > { %3131 = vmatprep.mubr.msk.f32.mxu1 %vm3574_vm5, %v3573_v11  ;;  %3100 = vmatpush3.msra.mxu1 %v2009_v56  ;;  %v2805_v56 = vld [vmem:[%s4464_s17] ss:$0 sm:$0xff] }
 0x7b9   : > { %3101 = vmatprep.subr.mxu1 %v3573_v11 }
 0x7ba   : > { %3102 = vmatpush3.msra.mxu1 %v2008_v57 }
 0x7bb   : > { %3103 = vmatprep.subr.mxu1 %v3573_v11 }
 0x7bc   : > { %3104 = vmatpush3.msra.mxu1 %v2007_v58 }
 0x7bd   : > { %3105 = vmatprep.subr.mxu1 %v3573_v11 }
 0x7be   : > { %3106 = vmatpush3.msra.mxu1 %v2006_v59 }
 0x7bf   : > { %3107 = vmatprep.subr.mxu1 %v3573_v11 }
 0x7c0   : > { %3108 = vmatpush3.msra.mxu1 %v2005_v60 }
 0x7c1   : > { %3109 = vmatprep.subr.mxu1 %v3573_v11 }
 0x7c2   : > { %3110 = vmatpush3.msra.mxu1 %v2004_v61 }
 0x7c3   : > { %3111 = vmatprep.subr.mxu1 %v3573_v11 }
 0x7c4   : > { %3112 = vmatpush3.msra.mxu1 %v2003_v62 }
 0x7c5   : > { %3113 = vmatprep.subr.mxu1 %v3573_v11 }
 0x7c6   : > { %3114 = vmatpush3.msra.mxu1 %v2002_v63 }
 0x7c7   : > { %3115 = vmatprep.subr.mxu1 %v3573_v11 }
 0x7c8   : > { %3116 = vmatpush3.msra.mxu1 %v2001_v0 }
 0x7c9   : > { %3117 = vmatprep.subr.mxu1 %v3573_v11 }
 0x7ca   : > { %3118 = vmatpush3.msra.mxu1 %v2000_v1 }
 0x7cb   : > { %3119 = vmatprep.subr.mxu1 %v3573_v11 }
 0x7cc   : > { %3120 = vmatpush3.msra.mxu1 %v1999_v2 }
 0x7cd   : > { %3121 = vmatprep.subr.mxu1 %v3573_v11 }
 0x7ce   : > { %3122 = vmatpush3.msra.mxu1 %v1998_v3 }
 0x7cf   : > { %3123 = vmatprep.subr.mxu1 %v3573_v11 }
 0x7d0   : > { %3124 = vmatpush3.msra.mxu1 %v1997_v4 }
 0x7d1   : > { %3125 = vmatprep.subr.mxu1 %v3573_v11 }
 0x7d2   : > { %3126 = vmatpush3.msra.mxu1 %v1996_v5 }
 0x7d3   : > { %3127 = vmatprep.subr.mxu1 %v3573_v11 }
 0x7d4   : > { %3128 = vmatpush3.msra.mxu1 %v1995_v6 }
 0x7d5   : > { %3129 = vmatprep.subr.mxu1 %v3573_v11 }
 0x7d6   : > { %3130 = vmatpush3.msra.mxu1 %v1994_v7 }
 0x7d7   : > { %3172 = vmatprep.subr.mxu1 %v3573_v11 }
 0x877   : > { %v1852_v41 = vpop.f32.mrf.mxu1 }
 0x878   : > { %v1856_v42 = vmul.f32 0.015625, %v1852_v41 }
 0x879   : > { %v3079_v44 = vpop.f32.mrf.mxu1 }
 0x87a   : > { %v1857_v45 = vadd.f32 1e-05, %v1856_v42 }
 0x87c   : > { %3348 = vrsqrt.f32 %v1857_v45 }
 0x889   : > { %v3349_v48 = vpop.eup %3348 }
 0x88a   : > { %1861 = vperm.xlu1 %3338, %v3349_v48  }
 0x905   : > { %v1862_v51 = vpop.permute.xlu1 %1861 }
 0x906   : > { %v1864_v52 = vmul.f32 %v1862_v51, %v1781_v35 }
 0x908   : > { %v1871_v54 = vmul.f32 %v2798_v50, %v1864_v52 }
 0x90a   : > { %v4140_v55 = vadd.f32 %v2799_v53, %v1871_v54 }
 0x90c   : > { %3097 = vmatmul.mubr.msk.f32.vlgmr.msra.gmra.mxu0 %vm1055_vm4, %v4140_v55 }
 0x90d   : > { %3135 = vmatpush3.msra.mxu0 %v3575_v43  ;;  %3150 = vmatprep.mubr.msk.f32.mxu0 %vm3574_vm5, %v3573_v11 }
 0x90e   : > { %3136 = vmatprep.subr.mxu0 %v3573_v11 }
 0x90f   : > { %3137 = vmatpush3.msra.mxu0 %v3575_v43 }
 0x910   : > { %3138 = vmatprep.subr.mxu0 %v3573_v11 }
 0x911   : > { %3139 = vmatpush3.msra.mxu0 %v3575_v43 }
 0x912   : > { %3140 = vmatprep.subr.mxu0 %v3573_v11 }
 0x913   : > { %3141 = vmatpush3.msra.mxu0 %v3575_v43 }
 0x914   : > { %3142 = vmatprep.subr.mxu0 %v3573_v11 }
 0x915   : > { %3143 = vmatpush3.msra.mxu0 %v3575_v43 }
 0x916   : > { %3144 = vmatprep.subr.mxu0 %v3573_v11 }
 0x917   : > { %3145 = vmatpush3.msra.mxu0 %v3575_v43 }
 0x918   : > { %3146 = vmatprep.subr.mxu0 %v3573_v11 }
 0x919   : > { %3147 = vmatpush3.msra.mxu0 %v3575_v43 }
 0x91a   : > { %3148 = vmatprep.subr.mxu0 %v3573_v11 }
 0x91b   : > { %3149 = vmatpush3.msra.mxu0 %v3575_v43 }
 0x91c   : > { %3153 = vmatprep.subr.mxu0 %v3573_v11 }
 0x9cc   : > { %v1963_v9 = vpop.f32.mrf.mxu0 }
 0x9cd   : > { %v1964_v10 = vadd.f32 %v2800_v8, %v1963_v9 }
 0x9ce   : > { %v3098_v12 = vpop.f32.mrf.mxu0 }
 0x9cf   : > { %v1968_v13 = vmul.f32 0.70710677, %v1964_v10  ;;  %v1967_v36 = vmul.f32 0.5, %v1964_v10  ;;  %v2810_v10 = vld [vmem:[%s935_s30] ss:$0 sm:$0xff] }
 0x9d1   : > { %v1971_v14 = vand.u32 2147483647, %v1968_v13  ;;  %vm1969_vm7 = vcmp.lt.f32.partialorder %v1968_v13, 0.0 }
 0x9d2   : > { %v1970_v34 = vsel %vm1969_vm7, -1.0, %v3575_v43 }
 0x9d3   : > { %v1972_v15 = vmul.f32 0.3275911, %v1971_v14  ;;  %v1985_v17 = vsub.f32 0.0, %v1971_v14 }
 0x9d5   : > { %v1973_v16 = vadd.f32 1.0, %v1972_v15  ;;  %v1986_v18 = vmul.f32 %v1985_v17, %v1971_v14 }
 0x9d7   : > { %3350 = vrcp.f32 %v1973_v16  ;;  %v1987_v21 = vmul.f32 1.442695, %v1986_v18 }
 0x9d9   : > { %3352 = vpow2.f32 %v1987_v21 }
 0x9e4   : > { %v3351_v19 = vpop.eup %3350 }
 0x9e5   : > { %v1976_v20 = vmul.f32 1.0614054, %v3351_v19 }
 0x9e6   : > { %v3353_v31 = vpop.eup %3352 }
 0x9e7   : > { %v1977_v22 = vadd.f32 -1.4531521, %v1976_v20 }
 0x9e9   : > { %v1978_v23 = vmul.f32 %v3351_v19, %v1977_v22 }
 0x9eb   : > { %v1979_v24 = vadd.f32 1.4214138, %v1978_v23 }
 0x9ed   : > { %v1980_v25 = vmul.f32 %v3351_v19, %v1979_v24 }
 0x9ef   : > { %v1981_v27 = vadd.f32 -0.28449672, %v1980_v25 }
 0x9f1   : > { %v1982_v28 = vmul.f32 %v3351_v19, %v1981_v27 }
 0x9f3   : > { %v1983_v29 = vadd.f32 0.2548296, %v1982_v28 }
 0x9f5   : > { %v1984_v30 = vmul.f32 %v3351_v19, %v1983_v29 }
 0x9f7   : > { %v1989_v32 = vmul.f32 %v3353_v31, %v1984_v30 }
 0x9f9   : > { %v1990_v33 = vsub.f32 1.0, %v1989_v32 }
 0x9fb   : > { %v1991_v35 = vmul.f32 %v1990_v33, %v1970_v34 }
 0x9fd   : > { %v1992_v26 = vadd.f32 1.0, %v1991_v35 }
 0x9ff   : > { %v1993_v37 = vmul.f32 %v1992_v26, %v1967_v36 }
 0xa01   : > { %3132 = vmatmul.mubr.f32.vlgmr.msra.gmra.mxu1 %v1993_v37 }
 0xa02   : > { %3173 = vmatpush3.msra.mxu1 %v3575_v43  ;;  %3188 = vmatprep.mubr.msk.f32.mxu1 %vm3574_vm5, %v3573_v11 }
 0xa03   : > { %3174 = vmatprep.subr.mxu1 %v3573_v11 }
 0xa04   : > { %3175 = vmatpush3.msra.mxu1 %v3575_v43 }
 0xa05   : > { %3176 = vmatprep.subr.mxu1 %v3573_v11 }
 0xa06   : > { %3177 = vmatpush3.msra.mxu1 %v3575_v43 }
 0xa07   : > { %3178 = vmatprep.subr.mxu1 %v3573_v11 }
 0xa08   : > { %3179 = vmatpush3.msra.mxu1 %v3575_v43 }
 0xa09   : > { %3180 = vmatprep.subr.mxu1 %v3573_v11 }
 0xa0a   : > { %3181 = vmatpush3.msra.mxu1 %v3575_v43 }
 0xa0b   : > { %3182 = vmatprep.subr.mxu1 %v3573_v11 }
 0xa0c   : > { %3183 = vmatpush3.msra.mxu1 %v3575_v43 }
 0xa0d   : > { %3184 = vmatprep.subr.mxu1 %v3573_v11 }
 0xa0e   : > { %3185 = vmatpush3.msra.mxu1 %v3575_v43 }
 0xa0f   : > { %3186 = vmatprep.subr.mxu1 %v3573_v11 }
 0xa10   : > { %3187 = vmatpush3.msra.mxu1 %v3575_v43 }
 0xac1   : > { %v2083_v39 = vpop.f32.mrf.mxu1 }
 0xac2   : > { %v2084_v40 = vadd.f32 %v2802_v38, %v2083_v39 }
 0xac3   : > { %v3133_v41 = vpop.f32.mrf.mxu1 }
 0xac4   : > { %v2087_v42 = vadd.f32 %v2084_v40, %v4140_v55 }
 0xac6   : > { %3151 = vmatmul.mubr.msk.f32.vlgmr.msra.gmra.mxu0 %vm1055_vm4, %v2087_v42 }
 0xac7   : > { %3154 = vmatpush3.msra.mxu0 %v3575_v43  ;;  %3169 = vmatprep.mubr.msk.f32.mxu0 %vm3574_vm5, %v3573_v11 }
 0xac8   : > { %3155 = vmatprep.subr.mxu0 %v3573_v11 }
 0xac9   : > { %3156 = vmatpush3.msra.mxu0 %v3575_v43 }
 0xaca   : > { %3157 = vmatprep.subr.mxu0 %v3573_v11 }
 0xacb   : > { %3158 = vmatpush3.msra.mxu0 %v3575_v43 }
 0xacc   : > { %3159 = vmatprep.subr.mxu0 %v3573_v11 }
 0xacd   : > { %3160 = vmatpush3.msra.mxu0 %v3575_v43 }
 0xace   : > { %3161 = vmatprep.subr.mxu0 %v3573_v11 }
 0xacf   : > { %3162 = vmatpush3.msra.mxu0 %v3575_v43 }
 0xad0   : > { %3163 = vmatprep.subr.mxu0 %v3573_v11 }
 0xad1   : > { %3164 = vmatpush3.msra.mxu0 %v3575_v43 }
 0xad2   : > { %3165 = vmatprep.subr.mxu0 %v3573_v11 }
 0xad3   : > { %3166 = vmatpush3.msra.mxu0 %v3575_v43 }
 0xad4   : > { %3167 = vmatprep.subr.mxu0 %v3573_v11 }
 0xad5   : > { %3168 = vmatpush3.msra.mxu0 %v3575_v43 }
 0xad6   : > { %3191 = vmatprep.subr.mxu0 %v3573_v11 }
 0xb86   : > { %v2159_v44 = vpop.f32.mrf.mxu0 }
 0xb87   : > { %v2163_v45 = vmul.f32 0.015625, %v2159_v44 }
 0xb88   : > { %v3152_v46 = vpop.f32.mrf.mxu0 }
 0xb89   : > { %2166 = vperm.xlu1 %3338, %v2163_v45  }
 0xc04   : > { %v2167_v47 = vpop.permute.xlu1 %2166 }
 0xc05   : > { %v2169_v48 = vsub.f32 %v2087_v42, %v2167_v47 }
 0xc07   : > { %v2170_v49 = vmul.f32 %v2169_v48, %v2169_v48 }
 0xc09   : > { %3170 = vmatmul.mubr.msk.f32.vlgmr.msra.gmra.mxu0 %vm1055_vm4, %v2170_v49 }
 0xc0a   : > { %3192 = vmatpush3.msra.mxu0 %v3575_v43  ;;  %3207 = vmatprep.mubr.msk.f32.mxu0 %vm3574_vm5, %v3573_v11 }
 0xc0b   : > { %3193 = vmatprep.subr.mxu0 %v3573_v11 }
 0xc0c   : > { %3194 = vmatpush3.msra.mxu0 %v3575_v43 }
 0xc0d   : > { %3195 = vmatprep.subr.mxu0 %v3573_v11 }
 0xc0e   : > { %3196 = vmatpush3.msra.mxu0 %v3575_v43 }
 0xc0f   : > { %3197 = vmatprep.subr.mxu0 %v3573_v11 }
 0xc10   : > { %3198 = vmatpush3.msra.mxu0 %v3575_v43 }
 0xc11   : > { %3199 = vmatprep.subr.mxu0 %v3573_v11 }
 0xc12   : > { %3200 = vmatpush3.msra.mxu0 %v3575_v43 }
 0xc13   : > { %3201 = vmatprep.subr.mxu0 %v3573_v11 }
 0xc14   : > { %3202 = vmatpush3.msra.mxu0 %v3575_v43 }
 0xc15   : > { %3203 = vmatprep.subr.mxu0 %v3573_v11 }
 0xc16   : > { %3204 = vmatpush3.msra.mxu0 %v3575_v43 }
 0xc17   : > { %3205 = vmatprep.subr.mxu0 %v3573_v11  ;;  %v2806_v11 = vld [vmem:[%s929_s14] ss:$0 sm:$0xff] }
 0xc18   : > { %3206 = vmatpush3.msra.mxu0 %v3575_v43 }
 0xcc9   : > { %v2240_v50 = vpop.f32.mrf.mxu0 }
 0xcca   : > { %v2244_v51 = vmul.f32 0.015625, %v2240_v50 }
 0xccb   : > { %v3171_v52 = vpop.f32.mrf.mxu0 }
 0xccc   : > { %v2245_v53 = vadd.f32 1e-05, %v2244_v51 }
 0xcce   : > { %3354 = vrsqrt.f32 %v2245_v53 }
 0xcdb   : > { %v3355_v54 = vpop.eup %3354 }
 0xcdc   : > { %2249 = vperm.xlu1 %3338, %v3355_v54  }
 0xd57   : > { %v2250_v57 = vpop.permute.xlu1 %2249 }
 0xd58   : > { %v2252_v58 = vmul.f32 %v2250_v57, %v2169_v48 }
 0xd5a   : > { %v2259_v43 = vmul.f32 %v2805_v56, %v2252_v58 }
 0xd5c   : > { %v2266_v59 = vadd.f32 %v2806_v11, %v2259_v43 }
 0xd5e   : > { %v2267_v60 = vadd.f32 %v2266_v59, %v4140_v55  ;;  %v2809_v55 = vld [vmem:[%s932_s28] ss:$0 sm:$0xff] }
 0xd60   : > { %3189 = vmatmul.mubr.msk.f32.vlgmr.msra.gmra.mxu1 %vm1055_vm4, %v2267_v60 }
 0xe20   : > { %v2339_v61 = vpop.f32.mrf.mxu1 }
 0xe21   : > { %v2343_v62 = vmul.f32 0.015625, %v2339_v61 }
 0xe22   : > { %v3190_v63 = vpop.f32.mrf.mxu1 }
 0xe23   : > { %2346 = vperm.xlu1 %3338, %v2343_v62  }
 0xe9e   : > { %v2347_v0 = vpop.permute.xlu1 %2346 }
 0xe9f   : > { %v2349_v1 = vsub.f32 %v2267_v60, %v2347_v0 }
 0xea1   : > { %v2350_v2 = vmul.f32 %v2349_v1, %v2349_v1 }
 0xea3   : > { %3208 = vmatmul.mubr.msk.f32.vlgmr.msra.gmra.mxu0 %vm1055_vm4, %v2350_v2 }
 0xf63   : > { %v2420_v3 = vpop.f32.mrf.mxu0 }
 0xf64   : > { %v2424_v4 = vmul.f32 0.015625, %v2420_v3 }
 0xf65   : > { %v3209_v5 = vpop.f32.mrf.mxu0 }
 0xf66   : > { %v2425_v6 = vadd.f32 1e-05, %v2424_v4 }
 0xf68   : > { %3356 = vrsqrt.f32 %v2425_v6 }
 0xf75   : > { %v3357_v7 = vpop.eup %3356 }
 0xf76   : > { %2429 = vperm.xlu1 %3338, %v3357_v7  }
 0xff1   : > { %v2430_v8 = vpop.permute.xlu1 %2429 }
 0xff2   : > { %v2432_v9 = vmul.f32 %v2430_v8, %v2349_v1 }
 0xff4   : > { %v2439_v12 = vmul.f32 %v2809_v55, %v2432_v9  ;;  %2451 = sbr.rel (%p2811_p2) target bundleno = 4090 (0xffa), region = 120 }
 0xff6   : > { %v2446_v13 = vadd.f32 %v2810_v10, %v2439_v12 }
 0xff8   : > { %2447 = vst.msk [vmem:[#allocation2] sm:$0xff] %vm1055_vm4, %v2446_v13 }
 0xff9   : > { %2452 = vst.msk [vmem:[%s890_s1] sm:$0xff] %vm1055_vm4, %v2446_v13 }
 0xffa PF: > { %s4468_s28 = sld [smem:[#allocation18_spill]]  ;;  %s2467_s8 = sshll.u32 %s890_s1, 4  ;;  %s2468_s8 = int_to_ptr.vmem [resolvable:$true] %s2467_s8 }
 0xffb   : > { %s4469_s23 = sld [smem:[#allocation14_spill]]  ;;  %s3440_s15 = scalar_lea.vmem %s2468_s8, 128 }
 0xffc   : > { %s4470_s24 = sld [smem:[#allocation26_spill]]  ;;  %p3441_p8 = scmp.ne.s32.totalorder %s2468_s8, %s3440_s15 }
 0xffd   : > { %s4471_s30 = sld [smem:[#allocation48_spill]]  ;;  %s3577_s9 = smov [#allocation9]  }
 0xffe   : > { %s3444_s10 = sshll.u32 %s3577_s9, 4  ;;  %s3445_s10 = int_to_ptr.vmem [resolvable:$false] %s3444_s10 }
 0xfff   : > { %s3446_s12 = scalar_lea.vmem %s3445_s10, 256  ;;  %p3447_p10 = scmp.lt.s32.totalorder %s2468_s8, %s3445_s10 }
0x1000   : > { %s2813_s22 = sshll.u32 %s4468_s28, 7  ;;  %p3448_p11 = scmp.lt.s32.totalorder %s3446_s12, %s3440_s15 }
0x1001   : > { %s4472_s5 = sand.u32 1, %s4469_s23  }
0x1002   : > { %s2454_s3 = scalar_lea.sflag [#allocation5], %s4472_s5  ;;  %p4473_p3 = scmp.ne.s32.totalorder %s4470_s24, 0 }
0x1003   : > { %s2465_s21 = scalar_lea.hbm %s4471_s30, %s2813_s22  ;;  %p3449_p12 = por %p3448_p11, %p3447_p10 }
0x1004   : > { %p3442_p6 = pnand %p3441_p8, %p4473_p3 }
0x1006   : > { %p3443_p9 = pneg %p3442_p6 }
0x1008   : > { %p3450_p0 = pnand %p3449_p12, %p3443_p9 }
0x100a   : > { %3453 = shalt.err (!%p3450_p0)
}
0x100b   : > { %s3454_s6 = scalar_lea.hbm %s2465_s21, 128  ;;  %s3458_s0 = scalar_lea.hbm %s4471_s30, 256 }
0x100c   : > { %p3455_p7 = scmp.ne.s32.totalorder %s2465_s21, %s3454_s6  ;;  %p3459_p1 = scmp.lt.s32.totalorder %s2465_s21, %s4471_s30 }
0x100d   : > { %p3460_p5 = scmp.lt.s32.totalorder %s3458_s0, %s3454_s6 }
0x100e   : > { %p3456_p4 = pnand %p3455_p7, %p4473_p3 }
0x100f   : > { %p3461_p2 = por %p3460_p5, %p3459_p1 }
0x1010   : > { %p3457_p13 = pneg %p3456_p4 }
0x1012   : > { %p3462_p8 = pnand %p3461_p2, %p3457_p13 }
0x1014   : > { %3465 = shalt.err (!%p3462_p8)
}
0x1015   : > { %3220 = dma.vmem_to_hbm [thread:$0]  (%p4473_p3), %s2468_s8, 128, %s2465_s21, %s2454_s3  }
0x1016 PF: > { %s4474_s26 = sld [smem:[#allocation21_spill]] }
0x1017   : > { %s4475_s16 = sld [smem:[#allocation13_spill]] }
0x1018   : > { %s4476_s20 = sld [smem:[#allocation27_spill]] }
0x101c   : > { %p3240_p6 = scmp.ge.s32.totalorder %s4474_s26, 2 }
0x101d   : > { %s2479_s14 = sand.u32 1, %s4475_s16  }
0x101e   : > { %p4477_p9 = scmp.ne.s32.totalorder %s4476_s20, 0  ;;  %s2480_s13 = scalar_lea.sflag [#allocation5], %s2479_s14 }
0x1020   : > { %p3234_p10 = pnand %p3240_p6, %p4477_p9 }
0x1022   : > { %p3235_p11 = pneg %p3234_p10 }
0x1024   : > { %3519 = dma.done.wait (%p3235_p11), %s2480_s13, 128  }
0x1025   : > { %3521 = vsyncadd (%p3235_p11), %s2480_s13, 4294967168  ;;  %s37_s4 = sadd.s32 1, %s4474_s26   ;;  %s4478_s1 = sld [smem:[#allocation14_spill]] }
0x1026   : > { %p34_p12 = scmp.ge.s32.totalorder %s37_s4, 6   ;;  %s4479_s22 = sld [smem:[#allocation15_spill]] }
0x1027   : > { %s4480_s23 = sld [smem:[#allocation25_spill]] }
0x1028   : > { %s4481_s24 = sld [smem:[#allocation16_spill]] }
0x1029   : > { %s4482_s2 = sld [smem:[#allocation17_spill]] }
0x102a   : > { %s4483_s25 = sld [smem:[#allocation24_spill]]  ;;  %36 = sbr.rel (!%p34_p12) target bundleno = 31 (0x1f), region = 218 }
0x102b   : > { %s4484_s3 = sld [smem:[#allocation19_spill]] }
0x102c   : > { %s4485_s26 = sld [smem:[#allocation20_spill]] }
0x102d   : > { %s4486_s27 = sld [smem:[#allocation22_spill]] }
0x102e   : > { %s4487_s28 = sld [smem:[#allocation23_spill]] }
0x102f   :  { %2485 = vsyncpa [#allocation4], 1 }
0x1030   :  { %2487 = vsyncpa [#allocation4 + $0x1], 1 }
0x1031   :  { %2488 = vsyncpa [#allocation7], 1 }
0x1032   :  { %2490 = vsyncpa [#allocation7 + $0x1], 1 }
0x1033   :  { %2491 = vsyncpa [#allocation5], 1 }
0x1034   :  { %2493 = vsyncpa [#allocation5 + $0x1], 1 }

</bundles_post_ra>
